<compile_context>
chip_gen: v6e
topology: v6e:2x2x1
jax: 0.10.0
libtpu: 0.0.40
codegen_flags: <defaults>
</compile_context>

<pallas_src>
import jax
import jax.numpy as jnp
from jax import lax
from jax.experimental import pallas as pl
from jax.experimental.pallas import tpu as pltpu


def _bilstm_kernel(x_ref, w_in_ref, b_in_ref, w_hh_ref,
                   hseq_ref, hn_ref, cn_ref,
                   gates_in_ref):
    """Fused duration_fc + bidirectional LSTM.

    Layouts (time-major, directions stacked on lanes, gate-interleaved columns):
      x_ref:        (T, B, 2)   time-major input
      w_in_ref:     (2, 8H)     duration_fc folded into input->gate weights, both dirs
      b_in_ref:     (1, 8H)     fc_b @ W_ih^T + b_ih + b_hh, both dirs
      w_hh_ref:     (2H, 8H)    block-diagonal hidden->gate weights, both dirs
      hseq_ref:     (T, B, 2H)  step-indexed hidden [h_fwd(t=s) | h_bwd(t=T-1-s)]
      hn_ref/cn_ref:(B, H)      forward-direction final (h_T, c_T)
      gates_in_ref: (T, B, 8H)  scratch: precomputed input-side gates

    Gate column order (width 2H per gate, fwd half then bwd half):
      [ i_f i_b | f_f f_b | g_f g_b | o_f o_b ]
    """
    T, B, _ = x_ref.shape
    H8 = w_in_ref.shape[1]
    H2 = H8 // 4
    H = H2 // 2

    # ---- Hoisted input->gate projection for all timesteps, both directions.
    # The contraction dim is only 2, so two VPU broadcast-multiplies beat a
    # degenerate K=2 MXU push; this runs once, outside the serial recurrence.
    x = x_ref[...]                                    # (T, B, 2)
    w0 = w_in_ref[0:1, :][None]                       # (1, 1, 8H)
    w1 = w_in_ref[1:2, :][None]                       # (1, 1, 8H)
    b_in = b_in_ref[...][None]                        # (1, 1, 8H)
    gates_in_ref[...] = (x[:, :, 0:1] * w0
                         + x[:, :, 1:2] * w1
                         + b_in)                      # (T, B, 8H)

    w_hh = w_hh_ref[...]                              # hoisted weight load

    # Lane mask: True on fwd-direction gate columns (first H of each 2H group).
    col = lax.broadcasted_iota(jnp.int32, (B, H8), 1)
    fwd_mask = (col % H2) < H

    h0 = jnp.zeros((B, H2), jnp.float32)              # [h_f | h_b]
    c0 = jnp.zeros((B, H2), jnp.float32)              # [c_f | c_b]

    # ---- Interleaved fwd+bwd recurrence: one MXU push on [h_f|h_b] against the
    # block-diagonal W_hh, one set of gate nonlinearities and one (B,2H) store
    # per step; fwd consumes time s, bwd consumes time T-1-s.
    def step(s, carry):
        h, c = carry                                  # (B, 2H)
        g_fwd = gates_in_ref[s]                       # (B, 8H)
        g_bwd = gates_in_ref[T - 1 - s]               # (B, 8H)
        g_in = jnp.where(fwd_mask, g_fwd, g_bwd)
        gates = g_in + jnp.dot(h, w_hh, preferred_element_type=jnp.float32)
        i = jax.nn.sigmoid(gates[:, 0:H2])
        f = jax.nn.sigmoid(gates[:, H2:2 * H2])
        g = jnp.tanh(gates[:, 2 * H2:3 * H2])
        o = jax.nn.sigmoid(gates[:, 3 * H2:4 * H2])
        c_new = f * c + i * g
        h_new = o * jnp.tanh(c_new)
        hseq_ref[pl.ds(s, 1), :, :] = h_new[None]     # single combined store
        return (h_new, c_new)

    unroll = True if T <= 32 else 4                   # LLO cross-iter visibility
    h_fin, c_fin = lax.fori_loop(0, T, step, (h0, c0), unroll=unroll)

    # Forward-direction final state (matches PyTorch encoder_state[i][:1]).
    hn_ref[...] = h_fin[:, 0:H]
    cn_ref[...] = c_fin[:, 0:H]


def _pack_params(params):
    """Fold duration_fc into the LSTM input weights and build the combined,
    gate-interleaved / block-diagonal weight layout used by the kernel."""
    H = params["fc_b"].shape[0]
    fc_wT = params["fc_w"].astype(jnp.float32).T       # (2, H)
    fc_b = params["fc_b"].astype(jnp.float32)          # (H,)

    def fold_dir(w_ih, w_hh, b_ih, b_hh):
        w_ih_T = w_ih.astype(jnp.float32).T            # (H, 4H)
        w_in = fc_wT @ w_ih_T                          # (2, 4H)
        b_in = fc_b @ w_ih_T + b_ih + b_hh             # (4H,)
        w_hh_T = w_hh.astype(jnp.float32).T            # (H, 4H)
        return w_in, b_in, w_hh_T

    w_in_f, b_in_f, w_hh_f = fold_dir(params["w_ih_f"], params["w_hh_f"],
                                      params["b_ih_f"], params["b_hh_f"])
    w_in_b, b_in_b, w_hh_b = fold_dir(params["w_ih_b"], params["w_hh_b"],
                                      params["b_ih_b"], params["b_hh_b"])

    # Interleave gate columns: [i_f i_b | f_f f_b | g_f g_b | o_f o_b].
    w_in = jnp.stack([w_in_f.reshape(2, 4, H),
                      w_in_b.reshape(2, 4, H)], axis=2).reshape(2, 8 * H)
    b_in = jnp.stack([b_in_f.reshape(4, H),
                      b_in_b.reshape(4, H)], axis=1).reshape(1, 8 * H)

    # Block-diagonal hidden->gate weight: rows 0:H act on h_f, rows H:2H on h_b.
    w_hh = jnp.zeros((2 * H, 4, 2, H), jnp.float32)
    w_hh = w_hh.at[:H, :, 0, :].set(w_hh_f.reshape(H, 4, H))
    w_hh = w_hh.at[H:, :, 1, :].set(w_hh_b.reshape(H, 4, H))
    w_hh = w_hh.reshape(2 * H, 8 * H)
    return w_in, b_in, w_hh


def encode_local_attn(x, params):
    """x: (B, T, 2) float32 (PyTorch batch_first). Returns
    (out (B,T,2H), (h_n[:1] (1,B,H), c_n[:1] (1,B,H)))."""
    B, T, _ = x.shape
    H = params["fc_b"].shape[0]
    w_in, b_in, w_hh = _pack_params(params)
    x_tm = jnp.transpose(x, (1, 0, 2)).astype(jnp.float32)    # (T, B, 2)

    vmem = pl.BlockSpec(memory_space=pltpu.MemorySpace.VMEM)
    hseq, h_n, c_n = pl.pallas_call(
        _bilstm_kernel,
        out_shape=(
            jax.ShapeDtypeStruct((T, B, 2 * H), jnp.float32),
            jax.ShapeDtypeStruct((B, H), jnp.float32),
            jax.ShapeDtypeStruct((B, H), jnp.float32),
        ),
        in_specs=[vmem] * 4,
        out_specs=(vmem,) * 3,
        scratch_shapes=[pltpu.VMEM((T, B, 8 * H), jnp.float32)],
        compiler_params=pltpu.CompilerParams(
            vmem_limit_bytes=64 * 1024 * 1024),
    )(x_tm, w_in, b_in, w_hh)

    # hseq[s] = [h_fwd at time s | h_bwd at time T-1-s]; undo the bwd reversal
    # (bulk layout plumbing in the wrapper, keeps per-step kernel stores wide).
    out = jnp.concatenate([hseq[:, :, :H], hseq[::-1, :, H:]], axis=-1)
    out = jnp.transpose(out, (1, 0, 2))                        # (B, T, 2H)
    return out, (h_n[None], c_n[None])


def init_params(key, hidden_dim):
    H = hidden_dim
    ks = jax.random.split(key, 10)
    b_fc = 1.0 / jnp.sqrt(2.0)
    b_l = 1.0 / jnp.sqrt(float(H))
    u = lambda k, shape, b: jax.random.uniform(k, shape, jnp.float32, -b, b)
    return dict(
        fc_w=u(ks[0], (H, 2), b_fc), fc_b=u(ks[1], (H,), b_fc),
        w_ih_f=u(ks[2], (4 * H, H), b_l), w_hh_f=u(ks[3], (4 * H, H), b_l),
        b_ih_f=u(ks[4], (4 * H,), b_l), b_hh_f=u(ks[5], (4 * H,), b_l),
        w_ih_b=u(ks[6], (4 * H, H), b_l), w_hh_b=u(ks[7], (4 * H, H), b_l),
        b_ih_b=u(ks[8], (4 * H,), b_l), b_hh_b=u(ks[9], (4 * H,), b_l),
    )


def reference(x, params):
    """Pure-JAX reproduction of the PyTorch forward, for validation."""
    H = params["fc_b"].shape[0]
    proj = x @ params["fc_w"].T + params["fc_b"]               # (B, T, H)
    xs = jnp.transpose(proj, (1, 0, 2))                        # (T, B, H)

    def run_dir(w_ih, w_hh, b, seq):
        def step(carry, xt):
            h, c = carry
            g = xt @ w_ih.T + h @ w_hh.T + b
            i, f, gg, o = jnp.split(g, 4, axis=-1)
            i, f, o = jax.nn.sigmoid(i), jax.nn.sigmoid(f), jax.nn.sigmoid(o)
            gg = jnp.tanh(gg)
            c = f * c + i * gg
            h = o * jnp.tanh(c)
            return (h, c), h
        B = seq.shape[1]
        (hT, cT), hs = lax.scan(step, (jnp.zeros((B, H)), jnp.zeros((B, H))), seq)
        return hs, hT, cT

    hs_f, hT, cT = run_dir(params["w_ih_f"], params["w_hh_f"],
                           params["b_ih_f"] + params["b_hh_f"], xs)
    hs_b, _, _ = run_dir(params["w_ih_b"], params["w_hh_b"],
                         params["b_ih_b"] + params["b_hh_b"], xs[::-1])
    hs_b = hs_b[::-1]
    out = jnp.transpose(jnp.concatenate([hs_f, hs_b], axis=-1), (1, 0, 2))
    return out, (hT[None], cT[None])


if __name__ == "__main__":
    key = jax.random.PRNGKey(0)
    pkey, xkey = jax.random.split(key)
    H, B, T = 32, 2, 8
    params = init_params(pkey, H)
    x = jax.random.normal(xkey, (B, T, 2), jnp.float32)

    out, (h_n, c_n) = jax.block_until_ready(encode_local_attn(x, params))

    out_r, (h_r, c_r) = reference(x, params)
    assert out.shape == (B, T, 2 * H)
    assert h_n.shape == (1, B, H) and c_n.shape == (1, B, H)
    assert jnp.allclose(out, out_r, atol=1e-4, rtol=1e-4)
    assert jnp.allclose(h_n, h_r, atol=1e-4, rtol=1e-4)
    assert jnp.allclose(c_n, c_r, atol=1e-4, rtol=1e-4)
    print("KERNEL_OK")
</pallas_src>

<mosaic_0001>
module attributes {stable_mosaic.version = 11 : i64} {
  func.func @_bilstm_kernel(%arg0: memref<8x2x2xf32, #tpu.memory_space<vmem>>, %arg1: memref<2x256xf32, #tpu.memory_space<vmem>>, %arg2: memref<1x256xf32, #tpu.memory_space<vmem>>, %arg3: memref<64x256xf32, #tpu.memory_space<vmem>>, %arg4: memref<8x2x64xf32, #tpu.memory_space<vmem>>, %arg5: memref<2x32xf32, #tpu.memory_space<vmem>>, %arg6: memref<2x32xf32, #tpu.memory_space<vmem>>, %arg7: memref<8x2x256xf32, #tpu.memory_space<vmem>>) attributes {dimension_semantics = [], scalar_prefetch = 0 : i64, scratch_operands = 1 : i64, tpu.core_type = #tpu.core_type<tc>} {
    %c0 = arith.constant 0 : index
    %c0_0 = arith.constant 0 : index
    %c0_1 = arith.constant 0 : index
    %0 = vector.load %arg0[%c0, %c0_0, %c0_1] : memref<8x2x2xf32, #tpu.memory_space<vmem>>, vector<8x2x2xf32>
    %c0_2 = arith.constant 0 : index
    %c0_3 = arith.constant 0 : index
    %1 = vector.load %arg1[%c0_2, %c0_3] : memref<2x256xf32, #tpu.memory_space<vmem>>, vector<1x256xf32>
    %2 = vector.shape_cast %1 : vector<1x256xf32> to vector<1x1x256xf32>
    %c1 = arith.constant 1 : index
    %c0_4 = arith.constant 0 : index
    %3 = vector.load %arg1[%c1, %c0_4] : memref<2x256xf32, #tpu.memory_space<vmem>>, vector<1x256xf32>
    %4 = vector.shape_cast %3 : vector<1x256xf32> to vector<1x1x256xf32>
    %c0_5 = arith.constant 0 : index
    %c0_6 = arith.constant 0 : index
    %5 = vector.load %arg2[%c0_5, %c0_6] : memref<1x256xf32, #tpu.memory_space<vmem>>, vector<1x256xf32>
    %6 = vector.shape_cast %5 : vector<1x256xf32> to vector<1x1x256xf32>
    %7 = vector.extract_strided_slice %0 {offsets = [0, 0, 0], sizes = [8, 2, 1], strides = [1, 1, 1]} : vector<8x2x2xf32> to vector<8x2x1xf32>
    %8 = vector.broadcast %7 : vector<8x2x1xf32> to vector<8x2x256xf32>
    %9 = vector.broadcast %2 : vector<1x1x256xf32> to vector<8x2x256xf32>
    %10 = arith.mulf %8, %9 : vector<8x2x256xf32>
    %11 = vector.extract_strided_slice %0 {offsets = [0, 0, 1], sizes = [8, 2, 1], strides = [1, 1, 1]} : vector<8x2x2xf32> to vector<8x2x1xf32>
    %12 = vector.broadcast %11 : vector<8x2x1xf32> to vector<8x2x256xf32>
    %13 = vector.broadcast %4 : vector<1x1x256xf32> to vector<8x2x256xf32>
    %14 = arith.mulf %12, %13 : vector<8x2x256xf32>
    %15 = arith.addf %10, %14 : vector<8x2x256xf32>
    %16 = vector.broadcast %6 : vector<1x1x256xf32> to vector<8x2x256xf32>
    %17 = arith.addf %15, %16 : vector<8x2x256xf32>
    %c0_7 = arith.constant 0 : index
    %c0_8 = arith.constant 0 : index
    %c0_9 = arith.constant 0 : index
    %18 = vector.load %arg7[%c0_7, %c0_8, %c0_9] : memref<8x2x256xf32, #tpu.memory_space<vmem>>, vector<8x2x256xf32>
    tpu.vector_store %arg7[%c0_7, %c0_8, %c0_9], %17 {strides = array<i32>} : memref<8x2x256xf32, #tpu.memory_space<vmem>>, vector<8x2x256xf32>,
    %c0_10 = arith.constant 0 : index
    %c0_11 = arith.constant 0 : index
    %19 = vector.load %arg3[%c0_10, %c0_11] : memref<64x256xf32, #tpu.memory_space<vmem>>, vector<64x256xf32>
    %20 = tpu.iota {dimensions = array<i32: 1>} : vector<2x256xi32>
    %c64_i32 = arith.constant 64 : i32
    %c0_i32 = arith.constant 0 : i32
    %21 = arith.cmpi eq, %c64_i32, %c0_i32 : i32
    %c1_i32 = arith.constant 1 : i32
    %22 = arith.select %21, %c1_i32, %c64_i32 : i32
    %23 = vector.broadcast %22 : i32 to vector<2x256xi32>
    %24 = arith.remsi %20, %23 : vector<2x256xi32>
    %c0_i32_12 = arith.constant 0 : i32
    %25 = vector.broadcast %c0_i32_12 : i32 to vector<2x256xi32>
    %26 = arith.cmpi ne, %24, %25 : vector<2x256xi32>
    %c0_i32_13 = arith.constant 0 : i32
    %27 = vector.broadcast %c0_i32_13 : i32 to vector<2x256xi32>
    %28 = arith.cmpi slt, %24, %27 : vector<2x256xi32>
    %c0_i32_14 = arith.constant 0 : i32
    %29 = arith.cmpi slt, %22, %c0_i32_14 : i32
    %30 = vector.broadcast %29 : i1 to vector<2x256xi1>
    %31 = vector.broadcast %30 : vector<2x256xi1> to vector<2x256xi1>
    %32 = arith.xori %28, %31 : vector<2x256xi1>
    %33 = arith.andi %32, %26 : vector<2x256xi1>
    %34 = vector.broadcast %22 : i32 to vector<2x256xi32>
    %35 = arith.addi %24, %34 : vector<2x256xi32>
    %36 = arith.select %33, %35, %24 : vector<2x256xi1>, vector<2x256xi32>
    %c32_i32 = arith.constant 32 : i32
    %37 = vector.broadcast %c32_i32 : i32 to vector<2x256xi32>
    %38 = arith.cmpi slt, %36, %37 : vector<2x256xi32>
    %cst = arith.constant 0.000000e+00 : f32
    %39 = vector.broadcast %cst : f32 to vector<2x64xf32>
    %cst_15 = arith.constant 0.000000e+00 : f32
    %40 = vector.broadcast %cst_15 : f32 to vector<2x64xf32>
    %c0_i32_16 = arith.constant 0 : i32
    %41 = arith.index_cast %c0_i32_16 : i32 to index
    %c0_17 = arith.constant 0 : index
    %c0_18 = arith.constant 0 : index
    %42 = vector.load %arg7[%41, %c0_17, %c0_18] : memref<8x2x256xf32, #tpu.memory_space<vmem>>, vector<1x2x256xf32>
    %43 = vector.shape_cast %42 : vector<1x2x256xf32> to vector<2x256xf32>
    %c7_i32 = arith.constant 7 : i32
    %44 = arith.subi %c7_i32, %c0_i32_16 : i32
    %45 = arith.index_cast %44 : i32 to index
    %c0_19 = arith.constant 0 : index
    %c0_20 = arith.constant 0 : index
    %46 = vector.load %arg7[%45, %c0_19, %c0_20] : memref<8x2x256xf32, #tpu.memory_space<vmem>>, vector<1x2x256xf32>
    %47 = vector.shape_cast %46 : vector<1x2x256xf32> to vector<2x256xf32>
    %48 = arith.select %38, %43, %47 : vector<2x256xi1>, vector<2x256xf32>
    %cst_21 = arith.constant dense<0.000000e+00> : vector<2x256xf32>
    %49 = tpu.matmul %39, %19, %cst_21 {dimension_numbers = #tpu.dot_dimension_numbers<[1], [0], [0], [1], [0, 0, 1, 1], [], []>} : vector<2x64xf32>, vector<64x256xf32>, vector<2x256xf32> -> vector<2x256xf32>
    %50 = arith.addf %48, %49 : vector<2x256xf32>
    %51 = vector.extract_strided_slice %50 {offsets = [0, 0], sizes = [2, 64], strides = [1, 1]} : vector<2x256xf32> to vector<2x64xf32>
    %52 = arith.negf %51 : vector<2x64xf32>
    %53 = math.exp %52 : vector<2x64xf32>
    %cst_22 = arith.constant 1.000000e+00 : f32
    %54 = vector.broadcast %cst_22 : f32 to vector<2x64xf32>
    %55 = arith.addf %54, %53 : vector<2x64xf32>
    %56 = arith.divf %54, %55 : vector<2x64xf32>
    %57 = vector.extract_strided_slice %50 {offsets = [0, 64], sizes = [2, 64], strides = [1, 1]} : vector<2x256xf32> to vector<2x64xf32>
    %58 = arith.negf %57 : vector<2x64xf32>
    %59 = math.exp %58 : vector<2x64xf32>
    %cst_23 = arith.constant 1.000000e+00 : f32
    %60 = vector.broadcast %cst_23 : f32 to vector<2x64xf32>
    %61 = arith.addf %60, %59 : vector<2x64xf32>
    %62 = arith.divf %60, %61 : vector<2x64xf32>
    %63 = vector.extract_strided_slice %50 {offsets = [0, 128], sizes = [2, 64], strides = [1, 1]} : vector<2x256xf32> to vector<2x64xf32>
    %64 = math.tanh %63 : vector<2x64xf32>
    %65 = vector.extract_strided_slice %50 {offsets = [0, 192], sizes = [2, 64], strides = [1, 1]} : vector<2x256xf32> to vector<2x64xf32>
    %66 = arith.negf %65 : vector<2x64xf32>
    %67 = math.exp %66 : vector<2x64xf32>
    %cst_24 = arith.constant 1.000000e+00 : f32
    %68 = vector.broadcast %cst_24 : f32 to vector<2x64xf32>
    %69 = arith.addf %68, %67 : vector<2x64xf32>
    %70 = arith.divf %68, %69 : vector<2x64xf32>
    %71 = arith.mulf %62, %40 : vector<2x64xf32>
    %72 = arith.mulf %56, %64 : vector<2x64xf32>
    %73 = arith.addf %71, %72 : vector<2x64xf32>
    %74 = math.tanh %73 : vector<2x64xf32>
    %75 = arith.mulf %70, %74 : vector<2x64xf32>
    %76 = vector.shape_cast %75 : vector<2x64xf32> to vector<1x2x64xf32>
    %77 = arith.index_cast %c0_i32_16 : i32 to index
    %c0_25 = arith.constant 0 : index
    %c0_26 = arith.constant 0 : index
    %78 = vector.load %arg4[%77, %c0_25, %c0_26] : memref<8x2x64xf32, #tpu.memory_space<vmem>>, vector<1x2x64xf32>
    tpu.vector_store %arg4[%77, %c0_25, %c0_26], %76 {strides = array<i32>} : memref<8x2x64xf32, #tpu.memory_space<vmem>>, vector<1x2x64xf32>,
    %c1_i32_27 = arith.constant 1 : i32
    %79 = arith.index_cast %c1_i32_27 : i32 to index
    %c0_28 = arith.constant 0 : index
    %c0_29 = arith.constant 0 : index
    %80 = vector.load %arg7[%79, %c0_28, %c0_29] : memref<8x2x256xf32, #tpu.memory_space<vmem>>, vector<1x2x256xf32>
    %81 = vector.shape_cast %80 : vector<1x2x256xf32> to vector<2x256xf32>
    %c7_i32_30 = arith.constant 7 : i32
    %82 = arith.subi %c7_i32_30, %c1_i32_27 : i32
    %83 = arith.index_cast %82 : i32 to index
    %c0_31 = arith.constant 0 : index
    %c0_32 = arith.constant 0 : index
    %84 = vector.load %arg7[%83, %c0_31, %c0_32] : memref<8x2x256xf32, #tpu.memory_space<vmem>>, vector<1x2x256xf32>
    %85 = vector.shape_cast %84 : vector<1x2x256xf32> to vector<2x256xf32>
    %86 = arith.select %38, %81, %85 : vector<2x256xi1>, vector<2x256xf32>
    %cst_33 = arith.constant dense<0.000000e+00> : vector<2x256xf32>
    %87 = tpu.matmul %75, %19, %cst_33 {dimension_numbers = #tpu.dot_dimension_numbers<[1], [0], [0], [1], [0, 0, 1, 1], [], []>} : vector<2x64xf32>, vector<64x256xf32>, vector<2x256xf32> -> vector<2x256xf32>
    %88 = arith.addf %86, %87 : vector<2x256xf32>
    %89 = vector.extract_strided_slice %88 {offsets = [0, 0], sizes = [2, 64], strides = [1, 1]} : vector<2x256xf32> to vector<2x64xf32>
    %90 = arith.negf %89 : vector<2x64xf32>
    %91 = math.exp %90 : vector<2x64xf32>
    %cst_34 = arith.constant 1.000000e+00 : f32
    %92 = vector.broadcast %cst_34 : f32 to vector<2x64xf32>
    %93 = arith.addf %92, %91 : vector<2x64xf32>
    %94 = arith.divf %92, %93 : vector<2x64xf32>
    %95 = vector.extract_strided_slice %88 {offsets = [0, 64], sizes = [2, 64], strides = [1, 1]} : vector<2x256xf32> to vector<2x64xf32>
    %96 = arith.negf %95 : vector<2x64xf32>
    %97 = math.exp %96 : vector<2x64xf32>
    %cst_35 = arith.constant 1.000000e+00 : f32
    %98 = vector.broadcast %cst_35 : f32 to vector<2x64xf32>
    %99 = arith.addf %98, %97 : vector<2x64xf32>
    %100 = arith.divf %98, %99 : vector<2x64xf32>
    %101 = vector.extract_strided_slice %88 {offsets = [0, 128], sizes = [2, 64], strides = [1, 1]} : vector<2x256xf32> to vector<2x64xf32>
    %102 = math.tanh %101 : vector<2x64xf32>
    %103 = vector.extract_strided_slice %88 {offsets = [0, 192], sizes = [2, 64], strides = [1, 1]} : vector<2x256xf32> to vector<2x64xf32>
    %104 = arith.negf %103 : vector<2x64xf32>
    %105 = math.exp %104 : vector<2x64xf32>
    %cst_36 = arith.constant 1.000000e+00 : f32
    %106 = vector.broadcast %cst_36 : f32 to vector<2x64xf32>
    %107 = arith.addf %106, %105 : vector<2x64xf32>
    %108 = arith.divf %106, %107 : vector<2x64xf32>
    %109 = arith.mulf %100, %73 : vector<2x64xf32>
    %110 = arith.mulf %94, %102 : vector<2x64xf32>
    %111 = arith.addf %109, %110 : vector<2x64xf32>
    %112 = math.tanh %111 : vector<2x64xf32>
    %113 = arith.mulf %108, %112 : vector<2x64xf32>
    %114 = vector.shape_cast %113 : vector<2x64xf32> to vector<1x2x64xf32>
    %115 = arith.index_cast %c1_i32_27 : i32 to index
    %c0_37 = arith.constant 0 : index
    %c0_38 = arith.constant 0 : index
    %116 = vector.load %arg4[%115, %c0_37, %c0_38] : memref<8x2x64xf32, #tpu.memory_space<vmem>>, vector<1x2x64xf32>
    tpu.vector_store %arg4[%115, %c0_37, %c0_38], %114 {strides = array<i32>} : memref<8x2x64xf32, #tpu.memory_space<vmem>>, vector<1x2x64xf32>,
    %c2_i32 = arith.constant 2 : i32
    %117 = arith.index_cast %c2_i32 : i32 to index
    %c0_39 = arith.constant 0 : index
    %c0_40 = arith.constant 0 : index
    %118 = vector.load %arg7[%117, %c0_39, %c0_40] : memref<8x2x256xf32, #tpu.memory_space<vmem>>, vector<1x2x256xf32>
    %119 = vector.shape_cast %118 : vector<1x2x256xf32> to vector<2x256xf32>
    %c7_i32_41 = arith.constant 7 : i32
    %120 = arith.subi %c7_i32_41, %c2_i32 : i32
    %121 = arith.index_cast %120 : i32 to index
    %c0_42 = arith.constant 0 : index
    %c0_43 = arith.constant 0 : index
    %122 = vector.load %arg7[%121, %c0_42, %c0_43] : memref<8x2x256xf32, #tpu.memory_space<vmem>>, vector<1x2x256xf32>
    %123 = vector.shape_cast %122 : vector<1x2x256xf32> to vector<2x256xf32>
    %124 = arith.select %38, %119, %123 : vector<2x256xi1>, vector<2x256xf32>
    %cst_44 = arith.constant dense<0.000000e+00> : vector<2x256xf32>
    %125 = tpu.matmul %113, %19, %cst_44 {dimension_numbers = #tpu.dot_dimension_numbers<[1], [0], [0], [1], [0, 0, 1, 1], [], []>} : vector<2x64xf32>, vector<64x256xf32>, vector<2x256xf32> -> vector<2x256xf32>
    %126 = arith.addf %124, %125 : vector<2x256xf32>
    %127 = vector.extract_strided_slice %126 {offsets = [0, 0], sizes = [2, 64], strides = [1, 1]} : vector<2x256xf32> to vector<2x64xf32>
    %128 = arith.negf %127 : vector<2x64xf32>
    %129 = math.exp %128 : vector<2x64xf32>
    %cst_45 = arith.constant 1.000000e+00 : f32
    %130 = vector.broadcast %cst_45 : f32 to vector<2x64xf32>
    %131 = arith.addf %130, %129 : vector<2x64xf32>
    %132 = arith.divf %130, %131 : vector<2x64xf32>
    %133 = vector.extract_strided_slice %126 {offsets = [0, 64], sizes = [2, 64], strides = [1, 1]} : vector<2x256xf32> to vector<2x64xf32>
    %134 = arith.negf %133 : vector<2x64xf32>
    %135 = math.exp %134 : vector<2x64xf32>
    %cst_46 = arith.constant 1.000000e+00 : f32
    %136 = vector.broadcast %cst_46 : f32 to vector<2x64xf32>
    %137 = arith.addf %136, %135 : vector<2x64xf32>
    %138 = arith.divf %136, %137 : vector<2x64xf32>
    %139 = vector.extract_strided_slice %126 {offsets = [0, 128], sizes = [2, 64], strides = [1, 1]} : vector<2x256xf32> to vector<2x64xf32>
    %140 = math.tanh %139 : vector<2x64xf32>
    %141 = vector.extract_strided_slice %126 {offsets = [0, 192], sizes = [2, 64], strides = [1, 1]} : vector<2x256xf32> to vector<2x64xf32>
    %142 = arith.negf %141 : vector<2x64xf32>
    %143 = math.exp %142 : vector<2x64xf32>
    %cst_47 = arith.constant 1.000000e+00 : f32
    %144 = vector.broadcast %cst_47 : f32 to vector<2x64xf32>
    %145 = arith.addf %144, %143 : vector<2x64xf32>
    %146 = arith.divf %144, %145 : vector<2x64xf32>
    %147 = arith.mulf %138, %111 : vector<2x64xf32>
    %148 = arith.mulf %132, %140 : vector<2x64xf32>
    %149 = arith.addf %147, %148 : vector<2x64xf32>
    %150 = math.tanh %149 : vector<2x64xf32>
    %151 = arith.mulf %146, %150 : vector<2x64xf32>
    %152 = vector.shape_cast %151 : vector<2x64xf32> to vector<1x2x64xf32>
    %153 = arith.index_cast %c2_i32 : i32 to index
    %c0_48 = arith.constant 0 : index
    %c0_49 = arith.constant 0 : index
    %154 = vector.load %arg4[%153, %c0_48, %c0_49] : memref<8x2x64xf32, #tpu.memory_space<vmem>>, vector<1x2x64xf32>
    tpu.vector_store %arg4[%153, %c0_48, %c0_49], %152 {strides = array<i32>} : memref<8x2x64xf32, #tpu.memory_space<vmem>>, vector<1x2x64xf32>,
    %c3_i32 = arith.constant 3 : i32
    %155 = arith.index_cast %c3_i32 : i32 to index
    %c0_50 = arith.constant 0 : index
    %c0_51 = arith.constant 0 : index
    %156 = vector.load %arg7[%155, %c0_50, %c0_51] : memref<8x2x256xf32, #tpu.memory_space<vmem>>, vector<1x2x256xf32>
    %157 = vector.shape_cast %156 : vector<1x2x256xf32> to vector<2x256xf32>
    %c7_i32_52 = arith.constant 7 : i32
    %158 = arith.subi %c7_i32_52, %c3_i32 : i32
    %159 = arith.index_cast %158 : i32 to index
    %c0_53 = arith.constant 0 : index
    %c0_54 = arith.constant 0 : index
    %160 = vector.load %arg7[%159, %c0_53, %c0_54] : memref<8x2x256xf32, #tpu.memory_space<vmem>>, vector<1x2x256xf32>
    %161 = vector.shape_cast %160 : vector<1x2x256xf32> to vector<2x256xf32>
    %162 = arith.select %38, %157, %161 : vector<2x256xi1>, vector<2x256xf32>
    %cst_55 = arith.constant dense<0.000000e+00> : vector<2x256xf32>
    %163 = tpu.matmul %151, %19, %cst_55 {dimension_numbers = #tpu.dot_dimension_numbers<[1], [0], [0], [1], [0, 0, 1, 1], [], []>} : vector<2x64xf32>, vector<64x256xf32>, vector<2x256xf32> -> vector<2x256xf32>
    %164 = arith.addf %162, %163 : vector<2x256xf32>
    %165 = vector.extract_strided_slice %164 {offsets = [0, 0], sizes = [2, 64], strides = [1, 1]} : vector<2x256xf32> to vector<2x64xf32>
    %166 = arith.negf %165 : vector<2x64xf32>
    %167 = math.exp %166 : vector<2x64xf32>
    %cst_56 = arith.constant 1.000000e+00 : f32
    %168 = vector.broadcast %cst_56 : f32 to vector<2x64xf32>
    %169 = arith.addf %168, %167 : vector<2x64xf32>
    %170 = arith.divf %168, %169 : vector<2x64xf32>
    %171 = vector.extract_strided_slice %164 {offsets = [0, 64], sizes = [2, 64], strides = [1, 1]} : vector<2x256xf32> to vector<2x64xf32>
    %172 = arith.negf %171 : vector<2x64xf32>
    %173 = math.exp %172 : vector<2x64xf32>
    %cst_57 = arith.constant 1.000000e+00 : f32
    %174 = vector.broadcast %cst_57 : f32 to vector<2x64xf32>
    %175 = arith.addf %174, %173 : vector<2x64xf32>
    %176 = arith.divf %174, %175 : vector<2x64xf32>
    %177 = vector.extract_strided_slice %164 {offsets = [0, 128], sizes = [2, 64], strides = [1, 1]} : vector<2x256xf32> to vector<2x64xf32>
    %178 = math.tanh %177 : vector<2x64xf32>
    %179 = vector.extract_strided_slice %164 {offsets = [0, 192], sizes = [2, 64], strides = [1, 1]} : vector<2x256xf32> to vector<2x64xf32>
    %180 = arith.negf %179 : vector<2x64xf32>
    %181 = math.exp %180 : vector<2x64xf32>
    %cst_58 = arith.constant 1.000000e+00 : f32
    %182 = vector.broadcast %cst_58 : f32 to vector<2x64xf32>
    %183 = arith.addf %182, %181 : vector<2x64xf32>
    %184 = arith.divf %182, %183 : vector<2x64xf32>
    %185 = arith.mulf %176, %149 : vector<2x64xf32>
    %186 = arith.mulf %170, %178 : vector<2x64xf32>
    %187 = arith.addf %185, %186 : vector<2x64xf32>
    %188 = math.tanh %187 : vector<2x64xf32>
    %189 = arith.mulf %184, %188 : vector<2x64xf32>
    %190 = vector.shape_cast %189 : vector<2x64xf32> to vector<1x2x64xf32>
    %191 = arith.index_cast %c3_i32 : i32 to index
    %c0_59 = arith.constant 0 : index
    %c0_60 = arith.constant 0 : index
    %192 = vector.load %arg4[%191, %c0_59, %c0_60] : memref<8x2x64xf32, #tpu.memory_space<vmem>>, vector<1x2x64xf32>
    tpu.vector_store %arg4[%191, %c0_59, %c0_60], %190 {strides = array<i32>} : memref<8x2x64xf32, #tpu.memory_space<vmem>>, vector<1x2x64xf32>,
    %c4_i32 = arith.constant 4 : i32
    %193 = arith.index_cast %c4_i32 : i32 to index
    %c0_61 = arith.constant 0 : index
    %c0_62 = arith.constant 0 : index
    %194 = vector.load %arg7[%193, %c0_61, %c0_62] : memref<8x2x256xf32, #tpu.memory_space<vmem>>, vector<1x2x256xf32>
    %195 = vector.shape_cast %194 : vector<1x2x256xf32> to vector<2x256xf32>
    %c7_i32_63 = arith.constant 7 : i32
    %196 = arith.subi %c7_i32_63, %c4_i32 : i32
    %197 = arith.index_cast %196 : i32 to index
    %c0_64 = arith.constant 0 : index
    %c0_65 = arith.constant 0 : index
    %198 = vector.load %arg7[%197, %c0_64, %c0_65] : memref<8x2x256xf32, #tpu.memory_space<vmem>>, vector<1x2x256xf32>
    %199 = vector.shape_cast %198 : vector<1x2x256xf32> to vector<2x256xf32>
    %200 = arith.select %38, %195, %199 : vector<2x256xi1>, vector<2x256xf32>
    %cst_66 = arith.constant dense<0.000000e+00> : vector<2x256xf32>
    %201 = tpu.matmul %189, %19, %cst_66 {dimension_numbers = #tpu.dot_dimension_numbers<[1], [0], [0], [1], [0, 0, 1, 1], [], []>} : vector<2x64xf32>, vector<64x256xf32>, vector<2x256xf32> -> vector<2x256xf32>
    %202 = arith.addf %200, %201 : vector<2x256xf32>
    %203 = vector.extract_strided_slice %202 {offsets = [0, 0], sizes = [2, 64], strides = [1, 1]} : vector<2x256xf32> to vector<2x64xf32>
    %204 = arith.negf %203 : vector<2x64xf32>
    %205 = math.exp %204 : vector<2x64xf32>
    %cst_67 = arith.constant 1.000000e+00 : f32
    %206 = vector.broadcast %cst_67 : f32 to vector<2x64xf32>
    %207 = arith.addf %206, %205 : vector<2x64xf32>
    %208 = arith.divf %206, %207 : vector<2x64xf32>
    %209 = vector.extract_strided_slice %202 {offsets = [0, 64], sizes = [2, 64], strides = [1, 1]} : vector<2x256xf32> to vector<2x64xf32>
    %210 = arith.negf %209 : vector<2x64xf32>
    %211 = math.exp %210 : vector<2x64xf32>
    %cst_68 = arith.constant 1.000000e+00 : f32
    %212 = vector.broadcast %cst_68 : f32 to vector<2x64xf32>
    %213 = arith.addf %212, %211 : vector<2x64xf32>
    %214 = arith.divf %212, %213 : vector<2x64xf32>
    %215 = vector.extract_strided_slice %202 {offsets = [0, 128], sizes = [2, 64], strides = [1, 1]} : vector<2x256xf32> to vector<2x64xf32>
    %216 = math.tanh %215 : vector<2x64xf32>
    %217 = vector.extract_strided_slice %202 {offsets = [0, 192], sizes = [2, 64], strides = [1, 1]} : vector<2x256xf32> to vector<2x64xf32>
    %218 = arith.negf %217 : vector<2x64xf32>
    %219 = math.exp %218 : vector<2x64xf32>
    %cst_69 = arith.constant 1.000000e+00 : f32
    %220 = vector.broadcast %cst_69 : f32 to vector<2x64xf32>
    %221 = arith.addf %220, %219 : vector<2x64xf32>
    %222 = arith.divf %220, %221 : vector<2x64xf32>
    %223 = arith.mulf %214, %187 : vector<2x64xf32>
    %224 = arith.mulf %208, %216 : vector<2x64xf32>
    %225 = arith.addf %223, %224 : vector<2x64xf32>
    %226 = math.tanh %225 : vector<2x64xf32>
    %227 = arith.mulf %222, %226 : vector<2x64xf32>
    %228 = vector.shape_cast %227 : vector<2x64xf32> to vector<1x2x64xf32>
    %229 = arith.index_cast %c4_i32 : i32 to index
    %c0_70 = arith.constant 0 : index
    %c0_71 = arith.constant 0 : index
    %230 = vector.load %arg4[%229, %c0_70, %c0_71] : memref<8x2x64xf32, #tpu.memory_space<vmem>>, vector<1x2x64xf32>
    tpu.vector_store %arg4[%229, %c0_70, %c0_71], %228 {strides = array<i32>} : memref<8x2x64xf32, #tpu.memory_space<vmem>>, vector<1x2x64xf32>,
    %c5_i32 = arith.constant 5 : i32
    %231 = arith.index_cast %c5_i32 : i32 to index
    %c0_72 = arith.constant 0 : index
    %c0_73 = arith.constant 0 : index
    %232 = vector.load %arg7[%231, %c0_72, %c0_73] : memref<8x2x256xf32, #tpu.memory_space<vmem>>, vector<1x2x256xf32>
    %233 = vector.shape_cast %232 : vector<1x2x256xf32> to vector<2x256xf32>
    %c7_i32_74 = arith.constant 7 : i32
    %234 = arith.subi %c7_i32_74, %c5_i32 : i32
    %235 = arith.index_cast %234 : i32 to index
    %c0_75 = arith.constant 0 : index
    %c0_76 = arith.constant 0 : index
    %236 = vector.load %arg7[%235, %c0_75, %c0_76] : memref<8x2x256xf32, #tpu.memory_space<vmem>>, vector<1x2x256xf32>
    %237 = vector.shape_cast %236 : vector<1x2x256xf32> to vector<2x256xf32>
    %238 = arith.select %38, %233, %237 : vector<2x256xi1>, vector<2x256xf32>
    %cst_77 = arith.constant dense<0.000000e+00> : vector<2x256xf32>
    %239 = tpu.matmul %227, %19, %cst_77 {dimension_numbers = #tpu.dot_dimension_numbers<[1], [0], [0], [1], [0, 0, 1, 1], [], []>} : vector<2x64xf32>, vector<64x256xf32>, vector<2x256xf32> -> vector<2x256xf32>
    %240 = arith.addf %238, %239 : vector<2x256xf32>
    %241 = vector.extract_strided_slice %240 {offsets = [0, 0], sizes = [2, 64], strides = [1, 1]} : vector<2x256xf32> to vector<2x64xf32>
    %242 = arith.negf %241 : vector<2x64xf32>
    %243 = math.exp %242 : vector<2x64xf32>
    %cst_78 = arith.constant 1.000000e+00 : f32
    %244 = vector.broadcast %cst_78 : f32 to vector<2x64xf32>
    %245 = arith.addf %244, %243 : vector<2x64xf32>
    %246 = arith.divf %244, %245 : vector<2x64xf32>
    %247 = vector.extract_strided_slice %240 {offsets = [0, 64], sizes = [2, 64], strides = [1, 1]} : vector<2x256xf32> to vector<2x64xf32>
    %248 = arith.negf %247 : vector<2x64xf32>
    %249 = math.exp %248 : vector<2x64xf32>
    %cst_79 = arith.constant 1.000000e+00 : f32
    %250 = vector.broadcast %cst_79 : f32 to vector<2x64xf32>
    %251 = arith.addf %250, %249 : vector<2x64xf32>
    %252 = arith.divf %250, %251 : vector<2x64xf32>
    %253 = vector.extract_strided_slice %240 {offsets = [0, 128], sizes = [2, 64], strides = [1, 1]} : vector<2x256xf32> to vector<2x64xf32>
    %254 = math.tanh %253 : vector<2x64xf32>
    %255 = vector.extract_strided_slice %240 {offsets = [0, 192], sizes = [2, 64], strides = [1, 1]} : vector<2x256xf32> to vector<2x64xf32>
    %256 = arith.negf %255 : vector<2x64xf32>
    %257 = math.exp %256 : vector<2x64xf32>
    %cst_80 = arith.constant 1.000000e+00 : f32
    %258 = vector.broadcast %cst_80 : f32 to vector<2x64xf32>
    %259 = arith.addf %258, %257 : vector<2x64xf32>
    %260 = arith.divf %258, %259 : vector<2x64xf32>
    %261 = arith.mulf %252, %225 : vector<2x64xf32>
    %262 = arith.mulf %246, %254 : vector<2x64xf32>
    %263 = arith.addf %261, %262 : vector<2x64xf32>
    %264 = math.tanh %263 : vector<2x64xf32>
    %265 = arith.mulf %260, %264 : vector<2x64xf32>
    %266 = vector.shape_cast %265 : vector<2x64xf32> to vector<1x2x64xf32>
    %267 = arith.index_cast %c5_i32 : i32 to index
    %c0_81 = arith.constant 0 : index
    %c0_82 = arith.constant 0 : index
    %268 = vector.load %arg4[%267, %c0_81, %c0_82] : memref<8x2x64xf32, #tpu.memory_space<vmem>>, vector<1x2x64xf32>
    tpu.vector_store %arg4[%267, %c0_81, %c0_82], %266 {strides = array<i32>} : memref<8x2x64xf32, #tpu.memory_space<vmem>>, vector<1x2x64xf32>,
    %c6_i32 = arith.constant 6 : i32
    %269 = arith.index_cast %c6_i32 : i32 to index
    %c0_83 = arith.constant 0 : index
    %c0_84 = arith.constant 0 : index
    %270 = vector.load %arg7[%269, %c0_83, %c0_84] : memref<8x2x256xf32, #tpu.memory_space<vmem>>, vector<1x2x256xf32>
    %271 = vector.shape_cast %270 : vector<1x2x256xf32> to vector<2x256xf32>
    %c7_i32_85 = arith.constant 7 : i32
    %272 = arith.subi %c7_i32_85, %c6_i32 : i32
    %273 = arith.index_cast %272 : i32 to index
    %c0_86 = arith.constant 0 : index
    %c0_87 = arith.constant 0 : index
    %274 = vector.load %arg7[%273, %c0_86, %c0_87] : memref<8x2x256xf32, #tpu.memory_space<vmem>>, vector<1x2x256xf32>
    %275 = vector.shape_cast %274 : vector<1x2x256xf32> to vector<2x256xf32>
    %276 = arith.select %38, %271, %275 : vector<2x256xi1>, vector<2x256xf32>
    %cst_88 = arith.constant dense<0.000000e+00> : vector<2x256xf32>
    %277 = tpu.matmul %265, %19, %cst_88 {dimension_numbers = #tpu.dot_dimension_numbers<[1], [0], [0], [1], [0, 0, 1, 1], [], []>} : vector<2x64xf32>, vector<64x256xf32>, vector<2x256xf32> -> vector<2x256xf32>
    %278 = arith.addf %276, %277 : vector<2x256xf32>
    %279 = vector.extract_strided_slice %278 {offsets = [0, 0], sizes = [2, 64], strides = [1, 1]} : vector<2x256xf32> to vector<2x64xf32>
    %280 = arith.negf %279 : vector<2x64xf32>
    %281 = math.exp %280 : vector<2x64xf32>
    %cst_89 = arith.constant 1.000000e+00 : f32
    %282 = vector.broadcast %cst_89 : f32 to vector<2x64xf32>
    %283 = arith.addf %282, %281 : vector<2x64xf32>
    %284 = arith.divf %282, %283 : vector<2x64xf32>
    %285 = vector.extract_strided_slice %278 {offsets = [0, 64], sizes = [2, 64], strides = [1, 1]} : vector<2x256xf32> to vector<2x64xf32>
    %286 = arith.negf %285 : vector<2x64xf32>
    %287 = math.exp %286 : vector<2x64xf32>
    %cst_90 = arith.constant 1.000000e+00 : f32
    %288 = vector.broadcast %cst_90 : f32 to vector<2x64xf32>
    %289 = arith.addf %288, %287 : vector<2x64xf32>
    %290 = arith.divf %288, %289 : vector<2x64xf32>
    %291 = vector.extract_strided_slice %278 {offsets = [0, 128], sizes = [2, 64], strides = [1, 1]} : vector<2x256xf32> to vector<2x64xf32>
    %292 = math.tanh %291 : vector<2x64xf32>
    %293 = vector.extract_strided_slice %278 {offsets = [0, 192], sizes = [2, 64], strides = [1, 1]} : vector<2x256xf32> to vector<2x64xf32>
    %294 = arith.negf %293 : vector<2x64xf32>
    %295 = math.exp %294 : vector<2x64xf32>
    %cst_91 = arith.constant 1.000000e+00 : f32
    %296 = vector.broadcast %cst_91 : f32 to vector<2x64xf32>
    %297 = arith.addf %296, %295 : vector<2x64xf32>
    %298 = arith.divf %296, %297 : vector<2x64xf32>
    %299 = arith.mulf %290, %263 : vector<2x64xf32>
    %300 = arith.mulf %284, %292 : vector<2x64xf32>
    %301 = arith.addf %299, %300 : vector<2x64xf32>
    %302 = math.tanh %301 : vector<2x64xf32>
    %303 = arith.mulf %298, %302 : vector<2x64xf32>
    %304 = vector.shape_cast %303 : vector<2x64xf32> to vector<1x2x64xf32>
    %305 = arith.index_cast %c6_i32 : i32 to index
    %c0_92 = arith.constant 0 : index
    %c0_93 = arith.constant 0 : index
    %306 = vector.load %arg4[%305, %c0_92, %c0_93] : memref<8x2x64xf32, #tpu.memory_space<vmem>>, vector<1x2x64xf32>
    tpu.vector_store %arg4[%305, %c0_92, %c0_93], %304 {strides = array<i32>} : memref<8x2x64xf32, #tpu.memory_space<vmem>>, vector<1x2x64xf32>,
    %c7_i32_94 = arith.constant 7 : i32
    %307 = arith.index_cast %c7_i32_94 : i32 to index
    %c0_95 = arith.constant 0 : index
    %c0_96 = arith.constant 0 : index
    %308 = vector.load %arg7[%307, %c0_95, %c0_96] : memref<8x2x256xf32, #tpu.memory_space<vmem>>, vector<1x2x256xf32>
    %309 = vector.shape_cast %308 : vector<1x2x256xf32> to vector<2x256xf32>
    %c7_i32_97 = arith.constant 7 : i32
    %310 = arith.subi %c7_i32_97, %c7_i32_94 : i32
    %311 = arith.index_cast %310 : i32 to index
    %c0_98 = arith.constant 0 : index
    %c0_99 = arith.constant 0 : index
    %312 = vector.load %arg7[%311, %c0_98, %c0_99] : memref<8x2x256xf32, #tpu.memory_space<vmem>>, vector<1x2x256xf32>
    %313 = vector.shape_cast %312 : vector<1x2x256xf32> to vector<2x256xf32>
    %314 = arith.select %38, %309, %313 : vector<2x256xi1>, vector<2x256xf32>
    %cst_100 = arith.constant dense<0.000000e+00> : vector<2x256xf32>
    %315 = tpu.matmul %303, %19, %cst_100 {dimension_numbers = #tpu.dot_dimension_numbers<[1], [0], [0], [1], [0, 0, 1, 1], [], []>} : vector<2x64xf32>, vector<64x256xf32>, vector<2x256xf32> -> vector<2x256xf32>
    %316 = arith.addf %314, %315 : vector<2x256xf32>
    %317 = vector.extract_strided_slice %316 {offsets = [0, 0], sizes = [2, 64], strides = [1, 1]} : vector<2x256xf32> to vector<2x64xf32>
    %318 = arith.negf %317 : vector<2x64xf32>
    %319 = math.exp %318 : vector<2x64xf32>
    %cst_101 = arith.constant 1.000000e+00 : f32
    %320 = vector.broadcast %cst_101 : f32 to vector<2x64xf32>
    %321 = arith.addf %320, %319 : vector<2x64xf32>
    %322 = arith.divf %320, %321 : vector<2x64xf32>
    %323 = vector.extract_strided_slice %316 {offsets = [0, 64], sizes = [2, 64], strides = [1, 1]} : vector<2x256xf32> to vector<2x64xf32>
    %324 = arith.negf %323 : vector<2x64xf32>
    %325 = math.exp %324 : vector<2x64xf32>
    %cst_102 = arith.constant 1.000000e+00 : f32
    %326 = vector.broadcast %cst_102 : f32 to vector<2x64xf32>
    %327 = arith.addf %326, %325 : vector<2x64xf32>
    %328 = arith.divf %326, %327 : vector<2x64xf32>
    %329 = vector.extract_strided_slice %316 {offsets = [0, 128], sizes = [2, 64], strides = [1, 1]} : vector<2x256xf32> to vector<2x64xf32>
    %330 = math.tanh %329 : vector<2x64xf32>
    %331 = vector.extract_strided_slice %316 {offsets = [0, 192], sizes = [2, 64], strides = [1, 1]} : vector<2x256xf32> to vector<2x64xf32>
    %332 = arith.negf %331 : vector<2x64xf32>
    %333 = math.exp %332 : vector<2x64xf32>
    %cst_103 = arith.constant 1.000000e+00 : f32
    %334 = vector.broadcast %cst_103 : f32 to vector<2x64xf32>
    %335 = arith.addf %334, %333 : vector<2x64xf32>
    %336 = arith.divf %334, %335 : vector<2x64xf32>
    %337 = arith.mulf %328, %301 : vector<2x64xf32>
    %338 = arith.mulf %322, %330 : vector<2x64xf32>
    %339 = arith.addf %337, %338 : vector<2x64xf32>
    %340 = math.tanh %339 : vector<2x64xf32>
    %341 = arith.mulf %336, %340 : vector<2x64xf32>
    %342 = vector.shape_cast %341 : vector<2x64xf32> to vector<1x2x64xf32>
    %343 = arith.index_cast %c7_i32_94 : i32 to index
    %c0_104 = arith.constant 0 : index
    %c0_105 = arith.constant 0 : index
    %344 = vector.load %arg4[%343, %c0_104, %c0_105] : memref<8x2x64xf32, #tpu.memory_space<vmem>>, vector<1x2x64xf32>
    tpu.vector_store %arg4[%343, %c0_104, %c0_105], %342 {strides = array<i32>} : memref<8x2x64xf32, #tpu.memory_space<vmem>>, vector<1x2x64xf32>,
    %c8_i32 = arith.constant 8 : i32
    %345 = vector.extract_strided_slice %341 {offsets = [0, 0], sizes = [2, 32], strides = [1, 1]} : vector<2x64xf32> to vector<2x32xf32>
    %c0_106 = arith.constant 0 : index
    %c0_107 = arith.constant 0 : index
    %346 = vector.load %arg5[%c0_106, %c0_107] : memref<2x32xf32, #tpu.memory_space<vmem>>, vector<2x32xf32>
    tpu.vector_store %arg5[%c0_106, %c0_107], %345 {strides = array<i32>} : memref<2x32xf32, #tpu.memory_space<vmem>>, vector<2x32xf32>,
    %347 = vector.extract_strided_slice %339 {offsets = [0, 0], sizes = [2, 32], strides = [1, 1]} : vector<2x64xf32> to vector<2x32xf32>
    %c0_108 = arith.constant 0 : index
    %c0_109 = arith.constant 0 : index
    %348 = vector.load %arg6[%c0_108, %c0_109] : memref<2x32xf32, #tpu.memory_space<vmem>>, vector<2x32xf32>
    tpu.vector_store %arg6[%c0_108, %c0_109], %347 {strides = array<i32>} : memref<2x32xf32, #tpu.memory_space<vmem>>, vector<2x32xf32>,
    return
  }
}

</mosaic_0001>

<bundles_post_ra>
// kernel: tpu_custom_call.1
= control target key start
LH: loop header
LB: loop body
LE: loop exit
PB: predicated region body
PF: predicated region fallthrough
CT: control target
= control target key end

     0   :  { %12 = vsyncpa [#allocation4], 0  ;;  %s2204_s0 = inlined_call_operand.vmem [shape: f32[8,2,2], index: 0, kind: input, shape index: {}]   ;;  %s2205_s1 = inlined_call_operand.vmem [shape: f32[2,256], index: 1, kind: input, shape index: {}]   ;;  %s2206_s2 = inlined_call_operand.vmem [shape: f32[1,256], index: 2, kind: input, shape index: {}]   ;;  %s2207_s3 = inlined_call_operand.hbm [shape: f32[64,256], index: 3, kind: input, shape index: {}]   ;;  %s2208_s4 = inlined_call_operand.hbm [shape: f32[8,2,64], index: 4, kind: output, shape index: {0}]   ;;  %s2209_s5 = inlined_call_operand.hbm [shape: f32[2,32], index: 5, kind: output, shape index: {1}]   ;;  %s2210_s6 = inlined_call_operand.hbm [shape: f32[2,32], index: 6, kind: output, shape index: {2}]  }
   0x1   :  { %13 = vsyncpa [#allocation5], 0 }
   0x2   :  { %14 = vsyncpa [#allocation8], 0  ;;  %s1703_s21 = smov [#allocation3]  }
   0x3   :  { %s26_s22 = sshll.u32 %s1703_s21, 4  ;;  %s27_s22 = int_to_ptr.vmem [resolvable:$true] %s26_s22 }
   0x4   :  { %s1625_s23 = scalar_lea.vmem %s27_s22, 2048  ;;  %p1630_p1 = scmp.lt.s32.totalorder %s27_s22, %s27_s22 }
   0x5   :  { %p1626_p0 = scmp.ne.s32.totalorder %s27_s22, %s1625_s23  ;;  %p1631_p2 = scmp.lt.s32.totalorder %s1625_s23, %s1625_s23 }
   0x7   :  { %p1632_p3 = por %p1631_p2, %p1630_p1 }
   0x9   :  { %p1633_p4 = pnand %p1632_p3, %p1626_p0 }
   0xb   :  { %1636 = shalt.err (!%p1633_p4)
}
   0xc   :  { %s1704_s24 = smov 256   ;;  %s1705_s25 = smov 16  }
   0xd   :  { %32 = dma.hbm_to_vmem [thread:$0]  %s2207_s3, 2048, %s27_s22, [#allocation4], %s1704_s24, %s1704_s24, %s1705_s25  }
   0xe   :  { %1697 = dma.done.wait [#allocation4], 2048  }
   0xf   :  { %1698 = vsyncadd [#allocation4], 4294965248  ;;  %v1706_v0 = vmov 0.0   ;;  %v1707_v1 = vmov 1   ;;  %v1708_v2 = vmov 0   ;;  %v1757_v3 = vld [vmem:[#allocation3 + $0x78] sm:$0xff]  ;;  %v89_v21 = vlaneseq }
  0x10   :  { %453 = vmatprep.mubr.f32.mxu0 %v1706_v0  ;;  %1511 = vset.pattern.permute.xlu1 %v1707_v1  ;;  %v1759_v4 = vld [vmem:[#allocation3 + $0x70] sm:$0xff]  ;;  %v1761_v5 = vld [vmem:[#allocation3 + $0x68] sm:$0xff]  ;;  %v1764_v6 = vld [vmem:[#allocation3 + $0x60] sm:$0xff]  ;;  %vm488_vm2 = vcmask 517120   ;;  %vm385_vm3 = vcmask 523264   ;;  %vm1399_vm4 = vcmask 254976  }
  0x11   :  { %1510 = vset.pattern.permute.xlu0 %v1708_v2  ;;  %584 = vmatprep.mubr.f32.mxu1 %v1706_v0  ;;  %v1768_v7 = vld [vmem:[#allocation3 + $0x58] sm:$0xff]  ;;  %v1772_v8 = vld [vmem:[#allocation3 + $0x50] sm:$0xff]  ;;  %v1776_v9 = vld [vmem:[#allocation3 + $0x48] sm:$0xff]  ;;  %v90_v22 = vshrl.u32 %v89_v21, 7  ;;  %v330_v53 = vand.u32 127, %v89_v21  ;;  %s1711_s25 = smov [#allocation6]  }
  0x12   :  { %405 = vmatprep.subr.mxu0 %v1757_v3  ;;  %536 = vmatprep.subr.mxu1 %v1757_v3  ;;  %v1780_v10 = vld [vmem:[#allocation3 + $0x40] sm:$0xff]  ;;  %v1787_v12 = vld [vmem:[#allocation3 + $0x38] sm:$0xff]  ;;  %v1790_v13 = vld [vmem:[#allocation3 + $0x30] sm:$0xff]  ;;  %s1411_s26 = sshll.u32 %s1711_s25, 4  ;;  %s1712_s27 = smov [#allocation9]   ;;  %s1412_s26 = int_to_ptr.vmem [resolvable:$true] %s1411_s26 }
  0x13   :  { %406 = vmatpush1.msra.mxu0 %v1759_v4  ;;  %537 = vmatpush1.msra.mxu1 %v1759_v4  ;;  %v36_v11 = vld [vmem:[%s2204_s0] sm:$0x3]  ;;  %v43_v14 = vld [vmem:[%s2204_s0 + $0xe] sm:$0x3]  ;;  %v1804_v17 = vld [vmem:[#allocation3 + $0x18] sm:$0xff]  ;;  %v91_v23 = vsub.s32 0, %v90_v22 }
  0x14   :  { %407 = vmatprep.subr.mxu0 %v1761_v5  ;;  %538 = vmatprep.subr.mxu1 %v1761_v5  ;;  %v1796_v15 = vld [vmem:[#allocation3 + $0x28] sm:$0xff]  ;;  %v1800_v16 = vld [vmem:[#allocation3 + $0x20] sm:$0xff]  ;;  %v1807_v18 = vld [vmem:[#allocation3 + $0x10] sm:$0xff]  ;;  %v95_v24 = vsub.s32 1, %v90_v22  ;;  %v331_v57 = vadd.s32 128, %v330_v53  ;;  %v336_v58 = vand.u32 63, %v330_v53 }
  0x15   :  { %408 = vmatpush1.msra.mxu0 %v1764_v6  ;;  %539 = vmatpush1.msra.mxu1 %v1764_v6  ;;  %v1810_v19 = vld [vmem:[#allocation3 + $0x8] sm:$0xff]  ;;  %v1814_v20 = vld [vmem:[#allocation3] sm:$0xff]  ;;  %s1434_s3 = sshll.u32 %s1712_s27, 4  ;;  %s1435_s3 = int_to_ptr.vmem [resolvable:$true] %s1434_s3 }
  0x16   :  { %409 = vmatprep.subr.mxu0 %v1768_v7  ;;  %540 = vmatprep.subr.mxu1 %v1768_v7  ;;  %v1450_v25 = vld [vmem:[%s2205_s1 + $0x1] ss:$2 sm:$0x3]  ;;  %v44_v26 = vld [vmem:[%s2205_s1] ss:$2 sm:$0x3] }
  0x17   :  { %410 = vmatpush1.msra.mxu0 %v1772_v8  ;;  %116 = vperm.xlu1 %1511, %v36_v11   ;;  %v1854_v27 = vrot.slane %v1450_v25, %v91_v23  ;;  %v1856_v28 = vrot.slane %v1450_v25, %v95_v24  ;;  %v1858_v29 = vrot.slane %v44_v26, %v91_v23  ;;  %v47_v31 = vld [vmem:[%s2206_s2] sm:$0x3]  ;;  %v343_v60 = vand.u32 63, %v331_v57  ;;  %s1709_s1 = smov 64   ;;  %v42_v57 = vld [vmem:[%s2204_s0 + $0xc] sm:$0x3] }
  0x18   :  { %411 = vmatprep.subr.mxu0 %v1776_v9  ;;  %50 = vperm.xlu0 %1510, %v36_v11   ;;  %v1860_v30 = vrot.slane %v44_v26, %v95_v24  ;;  %v1867_v36 = vrot.slane %v47_v31, %v91_v23  ;;  %v1869_v37 = vrot.slane %v47_v31, %v95_v24  ;;  %vm1883_vm0 = vcmp.lt.s32.totalorder %v336_v58, 32 }
  0x19   :  { %412 = vmatpush1.msra.mxu0 %v1780_v10  ;;  %541 = vmatpush1.msra.mxu1 %v1772_v8  ;;  %vm1893_vm1 = vcmp.lt.s32.totalorder %v343_v60, 32 }
  0x1a   :  { %413 = vmatprep.subr.mxu0 %v1787_v12  ;;  %542 = vmatprep.subr.mxu1 %v1776_v9 }
  0x1b   :  { %414 = vmatpush1.msra.mxu0 %v1790_v13  ;;  %144 = vperm.xlu1 %1511, %v43_v14  }
  0x1c   :  { %415 = vmatprep.subr.mxu0 %v1796_v15  ;;  %85 = vperm.xlu0 %1510, %v43_v14  }
  0x1d   :  { %416 = vmatpush1.msra.mxu0 %v1800_v16  ;;  %543 = vmatpush1.msra.mxu1 %v1780_v10 }
  0x1e   :  { %417 = vmatprep.subr.mxu0 %v1804_v17  ;;  %544 = vmatprep.subr.mxu1 %v1787_v12 }
  0x1f   :  { %418 = vmatpush1.msra.mxu0 %v1807_v18  ;;  %1512 = vset.pattern.permute.xlu1 %v1708_v2 }
  0x20   :  { %419 = vmatprep.subr.mxu0 %v1810_v19  ;;  %545 = vmatpush1.msra.mxu1 %v1790_v13 }
  0x21   :  { %420 = vmatpush1.msra.mxu0 %v1814_v20  ;;  %546 = vmatprep.subr.mxu1 %v1796_v15 }
  0x22   :  { %454 = vmatmul.mubr.f32.vlgmr.msra.gmra.mxu0 %v1706_v0  ;;  %547 = vmatpush1.msra.mxu1 %v1800_v16 }
  0x23   :  { %548 = vmatprep.subr.mxu1 %v1804_v17  ;;  %667 = vmatprep.subr.mxu0 %v1757_v3 }
  0x24   :  { %549 = vmatpush1.msra.mxu1 %v1807_v18  ;;  %668 = vmatpush1.msra.mxu0 %v1759_v4 }
  0x25   :  { %550 = vmatprep.subr.mxu1 %v1810_v19  ;;  %669 = vmatprep.subr.mxu0 %v1761_v5 }
  0x26   :  { %551 = vmatpush1.msra.mxu1 %v1814_v20  ;;  %670 = vmatpush1.msra.mxu0 %v1764_v6 }
  0x27   :  { %671 = vmatprep.subr.mxu0 %v1768_v7  ;;  %715 = vmatprep.mubr.f32.mxu0 %v1706_v0 }
  0x28   :  { %672 = vmatpush1.msra.mxu0 %v1772_v8  ;;  %798 = vmatprep.subr.mxu1 %v1757_v3 }
  0x29   :  { %673 = vmatprep.subr.mxu0 %v1776_v9 }
  0x2a   :  { %674 = vmatpush1.msra.mxu0 %v1780_v10 }
  0x2b   :  { %675 = vmatprep.subr.mxu0 %v1787_v12 }
  0x2c   :  { %676 = vmatpush1.msra.mxu0 %v1790_v13 }
  0x2d   :  { %677 = vmatprep.subr.mxu0 %v1796_v15 }
  0x2e   :  { %678 = vmatpush1.msra.mxu0 %v1800_v16 }
  0x2f   :  { %679 = vmatprep.subr.mxu0 %v1804_v17 }
  0x30   :  { %680 = vmatpush1.msra.mxu0 %v1807_v18 }
  0x31   :  { %681 = vmatprep.subr.mxu0 %v1810_v19 }
  0x32   :  { %682 = vmatpush1.msra.mxu0 %v1814_v20 }
  0x33   :  { %927 = vmatprep.subr.mxu0 %v1757_v3 }
  0x92   :  { %v117_v32 = vpop.permute.xlu1 %116 }
  0x93   :  { %v158_v33 = vmul.f32 %v1854_v27, %v117_v32  ;;  %v159_v34 = vmul.f32 %v1856_v28, %v117_v32  ;;  %v51_v35 = vpop.permute.xlu0 %50 }
  0x94   :  { %v99_v38 = vmul.f32 %v1858_v29, %v51_v35  ;;  %v100_v39 = vmul.f32 %v1860_v30, %v51_v35 }
  0x96   :  { %v174_v40 = vadd.f32 %v158_v33, %v99_v38  ;;  %v175_v41 = vadd.f32 %v159_v34, %v100_v39  ;;  %v145_v42 = vpop.permute.xlu1 %144 }
  0x97   :  { %v172_v43 = vmul.f32 %v1854_v27, %v145_v42  ;;  %v173_v44 = vmul.f32 %v1856_v28, %v145_v42  ;;  %v86_v45 = vpop.permute.xlu0 %85 }
  0x98   :  { %v201_v46 = vadd.f32 %v1867_v36, %v174_v40  ;;  %v202_v47 = vadd.f32 %v1869_v37, %v175_v41  ;;  %v113_v48 = vmul.f32 %v1858_v29, %v86_v45  ;;  %v114_v49 = vmul.f32 %v1860_v30, %v86_v45  ;;  %v37_v41 = vld [vmem:[%s2204_s0 + $0x2] sm:$0x3] }
  0x9a   :  { %v233_v50 = vcombine.low %v201_v46, %v202_v47  ;;  %v188_v51 = vadd.f32 %v172_v43, %v113_v48  ;;  %v189_v52 = vadd.f32 %v173_v44, %v114_v49 }
  0x9c   :  { %1451 = vst.sshfl [vmem:[#allocation2] sm:$0x33 pattern:$0x76325410] %v233_v50  ;;  %v215_v54 = vadd.f32 %v1867_v36, %v188_v51  ;;  %v216_v55 = vadd.f32 %v1869_v37, %v189_v52 }
  0x9e   :  { %v289_v56 = vcombine.low %v215_v54, %v216_v55 }
  0xa0   :  { %1458 = vst.sshfl [vmem:[#allocation2 + $0x1c] sm:$0x33 pattern:$0x76325410] %v289_v56 }
  0xa3   :  { %v1881_v59 = vld.sshfl [vmem:[#allocation2] sm:$0x33 pattern:$0x76325410] }
  0xa4   :  { %v1889_v62 = vcombine.high %v1881_v59, %v1881_v59 }
  0xa7   :  { %v1891_v63 = vld.sshfl [vmem:[#allocation2 + $0x1c] sm:$0x33 pattern:$0x76325410] }
  0xa8   :  { %v1899_v14 = vcombine.high %v1891_v63, %v1891_v63  ;;  %v1294_v21 = vsel %vm1883_vm0, %v1891_v63, %v1881_v59  ;;  %v383_v23 = vsel %vm1883_vm0, %v1881_v59, %v1891_v63 }
  0xaa   :  { %v1295_v22 = vsel %vm1893_vm1, %v1899_v14, %v1889_v62  ;;  %v384_v32 = vsel %vm1893_vm1, %v1889_v62, %v1899_v14 }
  0xe2   :  { %v455_v24 = vpop.f32.mrf.mxu0 }
  0xe3   :  { %v460_v25 = vadd.f32 %v455_v24, %v383_v23 }
  0xe4   :  { %v457_v31 = vpop.f32.mrf.mxu0 }
  0xe5   :  { %v1461_v26 = vmul.f32 -1.442695, %v460_v25  ;;  %v461_v33 = vadd.f32 %v457_v31, %v384_v32 }
  0xe7   :  { %1521 = vpow2.f32 %v1461_v26  ;;  %v1462_v42 = vmul.f32 -1.442695, %v461_v33 }
  0xe8   :  { %1523 = vtanh.f32 %v461_v33 }
  0xf4   :  { %v1522_v34 = vpop.eup %1521 }
  0xf5   :  { %v465_v35 = vadd.f32 1.0, %v1522_v34  ;;  %v1524_v38 = vpop.eup %1523 }
  0xf7   :  { %1525 = vrcp.f32 %v465_v35 }
  0xf8   :  { %1527 = vpow2.f32 %v1462_v42 }
 0x104   :  { %v1526_v39 = vpop.eup %1525 }
 0x105   :  { %v476_v40 = vmul.f32 %v1526_v39, %v1524_v38  ;;  %v1528_v43 = vpop.eup %1527  ;;  %v475_v45 = vmul.f32 0.0, %v1526_v39 }
 0x106   :  { %v472_v44 = vadd.f32 1.0, %v1528_v43 }
 0x107   :  { %478 = vrot.lane.b32.xlu0 %v476_v40, %s1709_s1 }
 0x108   :  { %1529 = vrcp.f32 %v472_v44 }
 0x10b   :  { %55 = vperm.xlu0 %1510, %v37_v41  }
 0x10f   :  { %1513 = vset.pattern.permute.xlu0 %v1707_v1 }
 0x110   :  { %120 = vperm.xlu0 %1513, %v37_v41  }
 0x114   :  { %1516 = vset.pattern.permute.xlu0 %v1708_v2 }
 0x115   :  { %v1530_v49 = vpop.eup %1529 }
 0x179   :  { %v479_v46 = vpop.permute.xlu0 %478 }
 0x17a   :  { %v1923_v47 = vadd.f32 %v479_v46, %v475_v45 }
 0x17c   :  { %1531 = vtanh.f32 %v1923_v47 }
 0x186   :  { %v56_v48 = vpop.permute.xlu0 %55 }
 0x187   :  { %v101_v53 = vmul.f32 %v1858_v29, %v56_v48  ;;  %v102_v54 = vmul.f32 %v1860_v30, %v56_v48 }
 0x189   :  { %v1532_v50 = vpop.eup %1531 }
 0x18a   :  { %v483_v51 = vmul.f32 %v1532_v50, %v1530_v49 }
 0x18b   :  { %v121_v52 = vpop.permute.xlu0 %120 }
 0x18c   :  { %v160_v55 = vmul.f32 %v1854_v27, %v121_v52  ;;  %v161_v56 = vmul.f32 %v1856_v28, %v121_v52  ;;  %485 = vrot.lane.b32.xlu1 %v483_v51, %s1709_s1 }
 0x18e   :  { %v176_v58 = vadd.f32 %v160_v55, %v101_v53  ;;  %v177_v60 = vadd.f32 %v161_v56, %v102_v54 }
 0x190   :  { %v203_v23 = vadd.f32 %v1867_v36, %v176_v58  ;;  %v204_v24 = vadd.f32 %v1869_v37, %v177_v60  ;;  %80 = vperm.xlu1 %1512, %v42_v57  }
 0x192   :  { %v241_v25 = vcombine.low %v203_v23, %v204_v24 }
 0x194   :  { %1452 = vst.sshfl [vmem:[#allocation2 + $0x4] sm:$0x33 pattern:$0x76325410] %v241_v25  ;;  %1514 = vset.pattern.permute.xlu1 %v1707_v1 }
 0x195   :  { %140 = vperm.xlu1 %1514, %v42_v57  }
 0x199   :  { %1515 = vset.pattern.permute.xlu1 %v1708_v2 }
 0x19b   :  { %v1963_v44 = vld.sshfl [vmem:[#allocation2 + $0x4] sm:$0x33 pattern:$0x76325410] }
 0x19c   :  { %v1969_v46 = vcombine.high %v1963_v44, %v1963_v44 }
 0x1fe   :  { %v486_v26 = vpop.permute.xlu1 %485 }
 0x1ff   :  { %489 = vst.msk [vmem:[#allocation6] sm:$0x3] %vm488_vm2, %v486_v26  ;;  %1465 = vmatmul.mubr.msk.f32.vlgmr.msra.gmra.mxu1 %vm385_vm3, %v486_v26 }
 0x200   :  { %799 = vmatpush1.msra.mxu1 %v1759_v4  ;;  %846 = vmatprep.mubr.f32.mxu1 %v1706_v0 }
 0x201   :  { %800 = vmatprep.subr.mxu1 %v1761_v5 }
 0x202   :  { %801 = vmatpush1.msra.mxu1 %v1764_v6 }
 0x203   :  { %802 = vmatprep.subr.mxu1 %v1768_v7 }
 0x204   :  { %803 = vmatpush1.msra.mxu1 %v1772_v8 }
 0x205   :  { %804 = vmatprep.subr.mxu1 %v1776_v9 }
 0x206   :  { %805 = vmatpush1.msra.mxu1 %v1780_v10 }
 0x207   :  { %806 = vmatprep.subr.mxu1 %v1787_v12 }
 0x208   :  { %807 = vmatpush1.msra.mxu1 %v1790_v13 }
 0x209   :  { %808 = vmatprep.subr.mxu1 %v1796_v15 }
 0x20a   :  { %809 = vmatpush1.msra.mxu1 %v1800_v16 }
 0x20b   :  { %v81_v31 = vpop.permute.xlu1 %80  ;;  %810 = vmatprep.subr.mxu1 %v1804_v17 }
 0x20c   :  { %811 = vmatpush1.msra.mxu1 %v1807_v18  ;;  %v111_v32 = vmul.f32 %v1858_v29, %v81_v31  ;;  %v112_v33 = vmul.f32 %v1860_v30, %v81_v31 }
 0x20d   :  { %812 = vmatprep.subr.mxu1 %v1810_v19 }
 0x20e   :  { %813 = vmatpush1.msra.mxu1 %v1814_v20 }
 0x20f   :  { %1056 = vmatprep.subr.mxu1 %v1757_v3 }
 0x210   :  { %v141_v34 = vpop.permute.xlu1 %140 }
 0x211   :  { %v170_v35 = vmul.f32 %v1854_v27, %v141_v34  ;;  %v171_v38 = vmul.f32 %v1856_v28, %v141_v34 }
 0x213   :  { %v186_v39 = vadd.f32 %v170_v35, %v111_v32  ;;  %v187_v40 = vadd.f32 %v171_v38, %v112_v33  ;;  %v38_v35 = vld [vmem:[%s2204_s0 + $0x4] sm:$0x3]  ;;  %v41_v38 = vld [vmem:[%s2204_s0 + $0xa] sm:$0x3] }
 0x215   :  { %v213_v41 = vadd.f32 %v1867_v36, %v186_v39  ;;  %v214_v42 = vadd.f32 %v1869_v37, %v187_v40 }
 0x217   :  { %v281_v43 = vcombine.low %v213_v41, %v214_v42 }
 0x219   :  { %1457 = vst.sshfl [vmem:[#allocation2 + $0x18] sm:$0x33 pattern:$0x76325410] %v281_v43 }
 0x220   :  { %v1965_v45 = vld.sshfl [vmem:[#allocation2 + $0x18] sm:$0x33 pattern:$0x76325410] }
 0x221   :  { %v1973_v48 = vcombine.high %v1965_v45, %v1965_v45  ;;  %v516_v50 = vsel %vm1883_vm0, %v1963_v44, %v1965_v45 }
 0x223   :  { %v1166_v49 = vsel %vm1893_vm1, %v1973_v48, %v1969_v46  ;;  %v517_v55 = vsel %vm1893_vm1, %v1969_v46, %v1973_v48 }
 0x2bf   :  { %v586_v51 = vpop.f32.mrf.mxu1 }
 0x2c0   :  { %v591_v52 = vadd.f32 %v586_v51, %v516_v50 }
 0x2c1   :  { %v588_v54 = vpop.f32.mrf.mxu1 }
 0x2c2   :  { %v1466_v53 = vmul.f32 -1.442695, %v591_v52  ;;  %v592_v56 = vadd.f32 %v588_v54, %v517_v55 }
 0x2c4   :  { %1533 = vpow2.f32 %v1466_v53  ;;  %v1467_v25 = vmul.f32 -1.442695, %v592_v56 }
 0x2c5   :  { %1535 = vtanh.f32 %v592_v56 }
 0x2d1   :  { %v1534_v57 = vpop.eup %1533 }
 0x2d2   :  { %v596_v58 = vadd.f32 1.0, %v1534_v57  ;;  %v1536_v60 = vpop.eup %1535 }
 0x2d4   :  { %1537 = vrcp.f32 %v596_v58 }
 0x2d5   :  { %1539 = vpow2.f32 %v1467_v25 }
 0x2e1   :  { %v1538_v23 = vpop.eup %1537 }
 0x2e2   :  { %v607_v24 = vmul.f32 %v1538_v23, %v1536_v60  ;;  %v1540_v26 = vpop.eup %1539  ;;  %v606_v32 = vmul.f32 %v1538_v23, %v1923_v47 }
 0x2e3   :  { %v603_v31 = vadd.f32 1.0, %v1540_v26 }
 0x2e4   :  { %609 = vrot.lane.b32.xlu1 %v607_v24, %s1709_s1 }
 0x2e5   :  { %1541 = vrcp.f32 %v603_v31 }
 0x2e8   :  { %60 = vperm.xlu1 %1515, %v38_v35  }
 0x2ec   :  { %1517 = vset.pattern.permute.xlu1 %v1707_v1 }
 0x2ed   :  { %124 = vperm.xlu1 %1517, %v38_v35  }
 0x2f1   :  { %136 = vperm.xlu1 %1517, %v41_v38  }
 0x2f2   :  { %v1542_v39 = vpop.eup %1541 }
 0x2f5   :  { %1518 = vset.pattern.permute.xlu1 %v1708_v2 }
 0x356   :  { %v610_v33 = vpop.permute.xlu1 %609 }
 0x357   :  { %v1989_v34 = vadd.f32 %v610_v33, %v606_v32 }
 0x359   :  { %1543 = vtanh.f32 %v1989_v34 }
 0x363   :  { %v61_v41 = vpop.permute.xlu1 %60 }
 0x364   :  { %v103_v43 = vmul.f32 %v1858_v29, %v61_v41  ;;  %v104_v50 = vmul.f32 %v1860_v30, %v61_v41 }
 0x366   :  { %v1544_v47 = vpop.eup %1543 }
 0x367   :  { %v614_v40 = vmul.f32 %v1544_v47, %v1542_v39 }
 0x368   :  { %v125_v51 = vpop.permute.xlu1 %124 }
 0x369   :  { %616 = vrot.lane.b32.xlu0 %v614_v40, %s1709_s1  ;;  %v162_v52 = vmul.f32 %v1854_v27, %v125_v51  ;;  %v163_v2 = vmul.f32 %v1856_v28, %v125_v51 }
 0x36b   :  { %v178_v53 = vadd.f32 %v162_v52, %v103_v43  ;;  %v179_v54 = vadd.f32 %v163_v2, %v104_v50 }
 0x36c   :  { %v137_v58 = vpop.permute.xlu1 %136 }
 0x36d   :  { %75 = vperm.xlu0 %1516, %v41_v38   ;;  %v205_v55 = vadd.f32 %v1867_v36, %v178_v53  ;;  %v206_v56 = vadd.f32 %v1869_v37, %v179_v54  ;;  %v168_v60 = vmul.f32 %v1854_v27, %v137_v58  ;;  %v169_v23 = vmul.f32 %v1856_v28, %v137_v58 }
 0x36f   :  { %v249_v57 = vcombine.low %v205_v55, %v206_v56 }
 0x371   :  { %1453 = vst.sshfl [vmem:[#allocation2 + $0x8] sm:$0x33 pattern:$0x76325410] %v249_v57 }
 0x378   :  { %v2032_v39 = vld.sshfl [vmem:[#allocation2 + $0x8] sm:$0x33 pattern:$0x76325410] }
 0x379   :  { %v2038_v40 = vcombine.high %v2032_v39, %v2032_v39 }
 0x3db   :  { %v617_v42 = vpop.permute.xlu0 %616 }
 0x3dc   :  { %620 = vst.msk [vmem:[#allocation6 + $0x2] sm:$0x3] %vm488_vm2, %v617_v42  ;;  %1470 = vmatmul.mubr.msk.f32.vlgmr.msra.gmra.mxu0 %vm385_vm3, %v617_v42 }
 0x3dd   :  { %928 = vmatpush1.msra.mxu0 %v1759_v4  ;;  %975 = vmatprep.mubr.f32.mxu0 %v1706_v0 }
 0x3de   :  { %929 = vmatprep.subr.mxu0 %v1761_v5 }
 0x3df   :  { %930 = vmatpush1.msra.mxu0 %v1764_v6 }
 0x3e0   :  { %931 = vmatprep.subr.mxu0 %v1768_v7 }
 0x3e1   :  { %932 = vmatpush1.msra.mxu0 %v1772_v8 }
 0x3e2   :  { %933 = vmatprep.subr.mxu0 %v1776_v9 }
 0x3e3   :  { %934 = vmatpush1.msra.mxu0 %v1780_v10 }
 0x3e4   :  { %935 = vmatprep.subr.mxu0 %v1787_v12 }
 0x3e5   :  { %936 = vmatpush1.msra.mxu0 %v1790_v13 }
 0x3e6   :  { %937 = vmatprep.subr.mxu0 %v1796_v15 }
 0x3e7   :  { %938 = vmatpush1.msra.mxu0 %v1800_v16 }
 0x3e8   :  { %v76_v24 = vpop.permute.xlu0 %75  ;;  %939 = vmatprep.subr.mxu0 %v1804_v17 }
 0x3e9   :  { %v109_v25 = vmul.f32 %v1858_v29, %v76_v24  ;;  %v110_v26 = vmul.f32 %v1860_v30, %v76_v24  ;;  %940 = vmatpush1.msra.mxu0 %v1807_v18  ;;  %v39_v24 = vld [vmem:[%s2204_s0 + $0x6] sm:$0x3] }
 0x3ea   :  { %941 = vmatprep.subr.mxu0 %v1810_v19 }
 0x3eb   :  { %v184_v31 = vadd.f32 %v168_v60, %v109_v25  ;;  %v185_v32 = vadd.f32 %v169_v23, %v110_v26  ;;  %942 = vmatpush1.msra.mxu0 %v1814_v20 }
 0x3ec   :  { %1185 = vmatprep.subr.mxu0 %v1757_v3 }
 0x3ed   :  { %v211_v33 = vadd.f32 %v1867_v36, %v184_v31  ;;  %v212_v35 = vadd.f32 %v1869_v37, %v185_v32 }
 0x3ef   :  { %v273_v38 = vcombine.low %v211_v33, %v212_v35 }
 0x3f1   :  { %1456 = vst.sshfl [vmem:[#allocation2 + $0x14] sm:$0x33 pattern:$0x76325410] %v273_v38 }
 0x3f8   :  { %v2034_v47 = vld.sshfl [vmem:[#allocation2 + $0x14] sm:$0x33 pattern:$0x76325410] }
 0x3f9   :  { %v2042_v41 = vcombine.high %v2034_v47, %v2034_v47  ;;  %v1036_v42 = vsel %vm1883_vm0, %v2034_v47, %v2032_v39  ;;  %v647_v50 = vsel %vm1883_vm0, %v2032_v39, %v2034_v47 }
 0x3fb   :  { %v1037_v43 = vsel %vm1893_vm1, %v2042_v41, %v2038_v40  ;;  %v648_v54 = vsel %vm1893_vm1, %v2038_v40, %v2042_v41 }
 0x49c   :  { %v717_v51 = vpop.f32.mrf.mxu0 }
 0x49d   :  { %v722_v52 = vadd.f32 %v717_v51, %v647_v50 }
 0x49e   :  { %v719_v53 = vpop.f32.mrf.mxu0 }
 0x49f   :  { %v1471_v2 = vmul.f32 -1.442695, %v722_v52  ;;  %v723_v55 = vadd.f32 %v719_v53, %v648_v54 }
 0x4a1   :  { %1545 = vpow2.f32 %v1471_v2  ;;  %v1472_v25 = vmul.f32 -1.442695, %v723_v55 }
 0x4a2   :  { %1547 = vtanh.f32 %v723_v55 }
 0x4ae   :  { %v1546_v56 = vpop.eup %1545 }
 0x4af   :  { %v727_v57 = vadd.f32 1.0, %v1546_v56  ;;  %v1548_v58 = vpop.eup %1547 }
 0x4b1   :  { %1549 = vrcp.f32 %v727_v57 }
 0x4b2   :  { %1551 = vpow2.f32 %v1472_v25 }
 0x4be   :  { %v1550_v60 = vpop.eup %1549 }
 0x4bf   :  { %v738_v23 = vmul.f32 %v1550_v60, %v1548_v58  ;;  %v1552_v26 = vpop.eup %1551  ;;  %v737_v32 = vmul.f32 %v1550_v60, %v1989_v34  ;;  %v40_v34 = vld [vmem:[%s2204_s0 + $0x8] sm:$0x3]  ;;  %s1710_s0 = smov [#allocation7]  }
 0x4c0   :  { %v734_v31 = vadd.f32 1.0, %v1552_v26  ;;  %s1424_s24 = sshll.u32 %s1710_s0, 4  ;;  %s1425_s24 = int_to_ptr.vmem [resolvable:$true] %s1424_s24 }
 0x4c1   :  { %740 = vrot.lane.b32.xlu0 %v738_v23, %s1709_s1  ;;  %s1637_s28 = scalar_lea.vmem %s1425_s24, 32  ;;  %p1642_p6 = scmp.lt.s32.totalorder %s1425_s24, %s1425_s24 }
 0x4c2   :  { %1553 = vrcp.f32 %v734_v31  ;;  %p1638_p5 = scmp.ne.s32.totalorder %s1425_s24, %s1637_s28  ;;  %p1643_p7 = scmp.lt.s32.totalorder %s1637_s28, %s1637_s28 }
 0x4c4   :  { %p1644_p8 = por %p1643_p7, %p1642_p6 }
 0x4c5   :  { %65 = vperm.xlu0 %1516, %v39_v24  }
 0x4c6   :  { %p1645_p9 = pnand %p1644_p8, %p1638_p5 }
 0x4c9   :  { %1519 = vset.pattern.permute.xlu0 %v1707_v1 }
 0x4ca   :  { %128 = vperm.xlu0 %1519, %v39_v24  }
 0x4cf   :  { %v1554_v50 = vpop.eup %1553 }
 0x533   :  { %v741_v33 = vpop.permute.xlu0 %740 }
 0x534   :  { %v2066_v35 = vadd.f32 %v741_v33, %v737_v32 }
 0x536   :  { %1555 = vtanh.f32 %v2066_v35 }
 0x540   :  { %v66_v38 = vpop.permute.xlu0 %65 }
 0x541   :  { %v105_v53 = vmul.f32 %v1858_v29, %v66_v38  ;;  %v106_v54 = vmul.f32 %v1860_v30, %v66_v38 }
 0x543   :  { %v1556_v51 = vpop.eup %1555 }
 0x544   :  { %v745_v52 = vmul.f32 %v1556_v51, %v1554_v50 }
 0x545   :  { %v129_v2 = vpop.permute.xlu0 %128 }
 0x546   :  { %v164_v55 = vmul.f32 %v1854_v27, %v129_v2  ;;  %v165_v56 = vmul.f32 %v1856_v28, %v129_v2  ;;  %747 = vrot.lane.b32.xlu1 %v745_v52, %s1709_s1 }
 0x548   :  { %v180_v57 = vadd.f32 %v164_v55, %v105_v53  ;;  %v181_v58 = vadd.f32 %v165_v56, %v106_v54 }
 0x54a   :  { %v207_v60 = vadd.f32 %v1867_v36, %v180_v57  ;;  %v208_v23 = vadd.f32 %v1869_v37, %v181_v58  ;;  %70 = vperm.xlu1 %1518, %v40_v34  }
 0x54c   :  { %v257_v24 = vcombine.low %v207_v60, %v208_v23 }
 0x54e   :  { %1454 = vst.sshfl [vmem:[#allocation2 + $0xc] sm:$0x33 pattern:$0x76325410] %v257_v24  ;;  %1520 = vset.pattern.permute.xlu1 %v1707_v1 }
 0x54f   :  { %132 = vperm.xlu1 %1520, %v40_v34  }
 0x555   :  { %v1473_v54 = vld.sshfl [vmem:[#allocation2 + $0xc] sm:$0x33 pattern:$0x76325410] }
 0x5b8   :  { %v748_v25 = vpop.permute.xlu1 %747 }
 0x5b9   :  { %751 = vst.msk [vmem:[#allocation6 + $0x4] sm:$0x3] %vm488_vm2, %v748_v25  ;;  %1475 = vmatmul.mubr.msk.f32.vlgmr.msra.gmra.mxu1 %vm385_vm3, %v748_v25 }
 0x5ba   :  { %1057 = vmatpush1.msra.mxu1 %v1759_v4  ;;  %1104 = vmatprep.mubr.f32.mxu1 %v1706_v0 }
 0x5bb   :  { %1058 = vmatprep.subr.mxu1 %v1761_v5 }
 0x5bc   :  { %1059 = vmatpush1.msra.mxu1 %v1764_v6 }
 0x5bd   :  { %1060 = vmatprep.subr.mxu1 %v1768_v7 }
 0x5be   :  { %1061 = vmatpush1.msra.mxu1 %v1772_v8 }
 0x5bf   :  { %1062 = vmatprep.subr.mxu1 %v1776_v9 }
 0x5c0   :  { %1063 = vmatpush1.msra.mxu1 %v1780_v10 }
 0x5c1   :  { %1064 = vmatprep.subr.mxu1 %v1787_v12 }
 0x5c2   :  { %1065 = vmatpush1.msra.mxu1 %v1790_v13 }
 0x5c3   :  { %1066 = vmatprep.subr.mxu1 %v1796_v15 }
 0x5c4   :  { %1067 = vmatpush1.msra.mxu1 %v1800_v16 }
 0x5c5   :  { %v71_v1 = vpop.permute.xlu1 %70  ;;  %1068 = vmatprep.subr.mxu1 %v1804_v17 }
 0x5c6   :  { %1069 = vmatpush1.msra.mxu1 %v1807_v18  ;;  %v107_v26 = vmul.f32 %v1858_v29, %v71_v1  ;;  %v108_v31 = vmul.f32 %v1860_v30, %v71_v1  ;;  %v764_v29 = vcombine.high %v1473_v54, %v1473_v54 }
 0x5c7   :  { %1070 = vmatprep.subr.mxu1 %v1810_v19 }
 0x5c8   :  { %1071 = vmatpush1.msra.mxu1 %v1814_v20 }
 0x5c9   :  { %1314 = vmatprep.subr.mxu1 %v1757_v3 }
 0x5ca   :  { %v133_v32 = vpop.permute.xlu1 %132 }
 0x5cb   :  { %v166_v33 = vmul.f32 %v1854_v27, %v133_v32  ;;  %v167_v38 = vmul.f32 %v1856_v28, %v133_v32 }
 0x5cd   :  { %v182_v50 = vadd.f32 %v166_v33, %v107_v26  ;;  %v183_v51 = vadd.f32 %v167_v38, %v108_v31 }
 0x5cf   :  { %v209_v52 = vadd.f32 %v1867_v36, %v182_v50  ;;  %v210_v2 = vadd.f32 %v1869_v37, %v183_v51 }
 0x5d1   :  { %v265_v53 = vcombine.low %v209_v52, %v210_v2 }
 0x5d3   :  { %1455 = vst.sshfl [vmem:[#allocation2 + $0x10] sm:$0x33 pattern:$0x76325410] %v265_v53 }
 0x5da   :  { %v1474_v55 = vld.sshfl [vmem:[#allocation2 + $0x10] sm:$0x33 pattern:$0x76325410] }
 0x5db   :  { %v775_v56 = vcombine.high %v1474_v55, %v1474_v55  ;;  %v778_v27 = vsel %vm1883_vm0, %v1473_v54, %v1474_v55 }
 0x5dd   :  { %v908_v3 = vsel %vm1893_vm1, %v775_v56, %v764_v29  ;;  %v779_v36 = vsel %vm1893_vm1, %v764_v29, %v775_v56 }
 0x679   :  { %v848_v30 = vpop.f32.mrf.mxu1 }
 0x67a   :  { %v853_v28 = vadd.f32 %v848_v30, %v778_v27 }
 0x67b   :  { %v850_v57 = vpop.f32.mrf.mxu1 }
 0x67c   :  { %v1476_v34 = vmul.f32 -1.442695, %v853_v28  ;;  %v854_v37 = vadd.f32 %v850_v57, %v779_v36 }
 0x67e   :  { %1557 = vpow2.f32 %v1476_v34  ;;  %v1477_v1 = vmul.f32 -1.442695, %v854_v37 }
 0x67f   :  { %1559 = vtanh.f32 %v854_v37 }
 0x68b   :  { %v1558_v58 = vpop.eup %1557 }
 0x68c   :  { %v858_v60 = vadd.f32 1.0, %v1558_v58  ;;  %v1560_v23 = vpop.eup %1559 }
 0x68e   :  { %1561 = vrcp.f32 %v858_v60 }
 0x68f   :  { %1563 = vpow2.f32 %v1477_v1 }
 0x69b   :  { %v1562_v24 = vpop.eup %1561 }
 0x69c   :  { %v869_v25 = vmul.f32 %v1562_v24, %v1560_v23  ;;  %v1564_v26 = vpop.eup %1563  ;;  %v868_v32 = vmul.f32 %v1562_v24, %v2066_v35  ;;  %v907_v35 = vsel %vm1883_vm0, %v1474_v55, %v1473_v54 }
 0x69d   :  { %v865_v31 = vadd.f32 1.0, %v1564_v26 }
 0x69e   :  { %871 = vrot.lane.b32.xlu1 %v869_v25, %s1709_s1 }
 0x69f   :  { %1565 = vrcp.f32 %v865_v31 }
 0x6ac   :  { %v1566_v50 = vpop.eup %1565 }
 0x710   :  { %v872_v33 = vpop.permute.xlu1 %871 }
 0x711   :  { %v874_v38 = vadd.f32 %v872_v33, %v868_v32 }
 0x713   :  { %1567 = vtanh.f32 %v874_v38 }
 0x720   :  { %v1568_v51 = vpop.eup %1567 }
 0x721   :  { %v876_v52 = vmul.f32 %v1568_v51, %v1566_v50 }
 0x723   :  { %878 = vrot.lane.b32.xlu0 %v876_v52, %s1709_s1 }
 0x795   :  { %v879_v2 = vpop.permute.xlu0 %878 }
 0x796   :  { %882 = vst.msk [vmem:[#allocation6 + $0x6] sm:$0x3] %vm488_vm2, %v879_v2  ;;  %1480 = vmatmul.mubr.msk.f32.vlgmr.msra.gmra.mxu0 %vm385_vm3, %v879_v2 }
 0x797   :  { %1186 = vmatpush1.msra.mxu0 %v1759_v4  ;;  %1233 = vmatprep.mubr.f32.mxu0 %v1706_v0 }
 0x798   :  { %1187 = vmatprep.subr.mxu0 %v1761_v5 }
 0x799   :  { %1188 = vmatpush1.msra.mxu0 %v1764_v6 }
 0x79a   :  { %1189 = vmatprep.subr.mxu0 %v1768_v7 }
 0x79b   :  { %1190 = vmatpush1.msra.mxu0 %v1772_v8 }
 0x79c   :  { %1191 = vmatprep.subr.mxu0 %v1776_v9 }
 0x79d   :  { %1192 = vmatpush1.msra.mxu0 %v1780_v10 }
 0x79e   :  { %1193 = vmatprep.subr.mxu0 %v1787_v12 }
 0x79f   :  { %1194 = vmatpush1.msra.mxu0 %v1790_v13 }
 0x7a0   :  { %1195 = vmatprep.subr.mxu0 %v1796_v15 }
 0x7a1   :  { %1196 = vmatpush1.msra.mxu0 %v1800_v16 }
 0x7a2   :  { %1197 = vmatprep.subr.mxu0 %v1804_v17 }
 0x7a3   :  { %1198 = vmatpush1.msra.mxu0 %v1807_v18 }
 0x7a4   :  { %1199 = vmatprep.subr.mxu0 %v1810_v19 }
 0x7a5   :  { %1200 = vmatpush1.msra.mxu0 %v1814_v20 }
 0x856   :  { %v977_v53 = vpop.f32.mrf.mxu0 }
 0x857   :  { %v982_v29 = vadd.f32 %v977_v53, %v907_v35 }
 0x858   :  { %v979_v27 = vpop.f32.mrf.mxu0 }
 0x859   :  { %v1481_v56 = vmul.f32 -1.442695, %v982_v29  ;;  %v983_v30 = vadd.f32 %v979_v27, %v908_v3 }
 0x85b   :  { %1569 = vpow2.f32 %v1481_v56  ;;  %v1482_v58 = vmul.f32 -1.442695, %v983_v30 }
 0x85c   :  { %1571 = vtanh.f32 %v983_v30 }
 0x868   :  { %v1570_v28 = vpop.eup %1569 }
 0x869   :  { %v987_v34 = vadd.f32 1.0, %v1570_v28  ;;  %v1572_v57 = vpop.eup %1571 }
 0x86b   :  { %1573 = vrcp.f32 %v987_v34 }
 0x86c   :  { %1575 = vpow2.f32 %v1482_v58 }
 0x878   :  { %v1574_v36 = vpop.eup %1573 }
 0x879   :  { %v998_v37 = vmul.f32 %v1574_v36, %v1572_v57  ;;  %v1576_v60 = vpop.eup %1575  ;;  %v997_v54 = vmul.f32 %v1574_v36, %v874_v38 }
 0x87a   :  { %v994_v23 = vadd.f32 1.0, %v1576_v60 }
 0x87b   :  { %1000 = vrot.lane.b32.xlu1 %v998_v37, %s1709_s1 }
 0x87c   :  { %1577 = vrcp.f32 %v994_v23 }
 0x889   :  { %v1578_v25 = vpop.eup %1577 }
 0x8ed   :  { %v1001_v55 = vpop.permute.xlu1 %1000 }
 0x8ee   :  { %v1003_v24 = vadd.f32 %v1001_v55, %v997_v54 }
 0x8f0   :  { %1579 = vtanh.f32 %v1003_v24 }
 0x8fd   :  { %v1580_v3 = vpop.eup %1579 }
 0x8fe   :  { %v1005_v1 = vmul.f32 %v1580_v3, %v1578_v25 }
 0x900   :  { %1007 = vrot.lane.b32.xlu0 %v1005_v1, %s1709_s1 }
 0x972   :  { %v1008_v26 = vpop.permute.xlu0 %1007 }
 0x973   :  { %1011 = vst.msk [vmem:[#allocation6 + $0x8] sm:$0x3] %vm488_vm2, %v1008_v26  ;;  %1485 = vmatmul.mubr.msk.f32.vlgmr.msra.gmra.mxu1 %vm385_vm3, %v1008_v26 }
 0x974   :  { %1315 = vmatpush1.msra.mxu1 %v1759_v4  ;;  %1362 = vmatprep.mubr.f32.mxu1 %v1706_v0 }
 0x975   :  { %1316 = vmatprep.subr.mxu1 %v1761_v5 }
 0x976   :  { %1317 = vmatpush1.msra.mxu1 %v1764_v6 }
 0x977   :  { %1318 = vmatprep.subr.mxu1 %v1768_v7 }
 0x978   :  { %1319 = vmatpush1.msra.mxu1 %v1772_v8 }
 0x979   :  { %1320 = vmatprep.subr.mxu1 %v1776_v9 }
 0x97a   :  { %1321 = vmatpush1.msra.mxu1 %v1780_v10 }
 0x97b   :  { %1322 = vmatprep.subr.mxu1 %v1787_v12 }
 0x97c   :  { %1323 = vmatpush1.msra.mxu1 %v1790_v13 }
 0x97d   :  { %1324 = vmatprep.subr.mxu1 %v1796_v15 }
 0x97e   :  { %1325 = vmatpush1.msra.mxu1 %v1800_v16 }
 0x97f   :  { %1326 = vmatprep.subr.mxu1 %v1804_v17 }
 0x980   :  { %1327 = vmatpush1.msra.mxu1 %v1807_v18 }
 0x981   :  { %1328 = vmatprep.subr.mxu1 %v1810_v19 }
 0x982   :  { %1329 = vmatpush1.msra.mxu1 %v1814_v20 }
 0xa33   :  { %v1106_v0 = vpop.f32.mrf.mxu1 }
 0xa34   :  { %v1111_v4 = vadd.f32 %v1106_v0, %v1036_v42  ;;  %v1165_v42 = vsel %vm1883_vm0, %v1965_v45, %v1963_v44 }
 0xa35   :  { %v1108_v6 = vpop.f32.mrf.mxu1 }
 0xa36   :  { %v1486_v5 = vmul.f32 -1.442695, %v1111_v4  ;;  %v1112_v7 = vadd.f32 %v1108_v6, %v1037_v43 }
 0xa38   :  { %1581 = vpow2.f32 %v1486_v5  ;;  %v1487_v15 = vmul.f32 -1.442695, %v1112_v7 }
 0xa39   :  { %1583 = vtanh.f32 %v1112_v7 }
 0xa45   :  { %v1582_v8 = vpop.eup %1581 }
 0xa46   :  { %v1116_v9 = vadd.f32 1.0, %v1582_v8  ;;  %v1584_v10 = vpop.eup %1583 }
 0xa48   :  { %1585 = vrcp.f32 %v1116_v9 }
 0xa49   :  { %1587 = vpow2.f32 %v1487_v15 }
 0xa55   :  { %v1586_v12 = vpop.eup %1585 }
 0xa56   :  { %v1127_v13 = vmul.f32 %v1586_v12, %v1584_v10  ;;  %v1588_v16 = vpop.eup %1587  ;;  %v1126_v18 = vmul.f32 %v1586_v12, %v1003_v24 }
 0xa57   :  { %v1123_v17 = vadd.f32 1.0, %v1588_v16 }
 0xa58   :  { %1129 = vrot.lane.b32.xlu1 %v1127_v13, %s1709_s1 }
 0xa59   :  { %1589 = vrcp.f32 %v1123_v17 }
 0xa66   :  { %v1590_v39 = vpop.eup %1589 }
 0xaca   :  { %v1130_v19 = vpop.permute.xlu1 %1129 }
 0xacb   :  { %v1132_v20 = vadd.f32 %v1130_v19, %v1126_v18 }
 0xacd   :  { %1591 = vtanh.f32 %v1132_v20 }
 0xada   :  { %v1592_v47 = vpop.eup %1591 }
 0xadb   :  { %v1134_v40 = vmul.f32 %v1592_v47, %v1590_v39 }
 0xadd   :  { %1136 = vrot.lane.b32.xlu0 %v1134_v40, %s1709_s1 }
 0xb4f   :  { %v1137_v41 = vpop.permute.xlu0 %1136 }
 0xb50   :  { %1140 = vst.msk [vmem:[#allocation6 + $0xa] sm:$0x3] %vm488_vm2, %v1137_v41  ;;  %1490 = vmatmul.mubr.msk.f32.vlgmr.msra.gmra.mxu0 %vm385_vm3, %v1137_v41 }
 0xc10   :  { %v1235_v43 = vpop.f32.mrf.mxu0 }
 0xc11   :  { %v1240_v31 = vadd.f32 %v1235_v43, %v1165_v42 }
 0xc12   :  { %v1237_v33 = vpop.f32.mrf.mxu0 }
 0xc13   :  { %v1491_v32 = vmul.f32 -1.442695, %v1240_v31  ;;  %v1241_v38 = vadd.f32 %v1237_v33, %v1166_v49 }
 0xc15   :  { %1593 = vpow2.f32 %v1491_v32  ;;  %v1492_v44 = vmul.f32 -1.442695, %v1241_v38 }
 0xc16   :  { %1595 = vtanh.f32 %v1241_v38 }
 0xc22   :  { %v1594_v50 = vpop.eup %1593 }
 0xc23   :  { %v1245_v51 = vadd.f32 1.0, %v1594_v50  ;;  %v1596_v52 = vpop.eup %1595 }
 0xc25   :  { %1597 = vrcp.f32 %v1245_v51 }
 0xc26   :  { %1599 = vpow2.f32 %v1492_v44 }
 0xc32   :  { %v1598_v2 = vpop.eup %1597 }
 0xc33   :  { %v1256_v35 = vmul.f32 %v1598_v2, %v1596_v52  ;;  %v1600_v45 = vpop.eup %1599  ;;  %v1255_v29 = vmul.f32 %v1598_v2, %v1132_v20 }
 0xc34   :  { %v1252_v53 = vadd.f32 1.0, %v1600_v45 }
 0xc35   :  { %1258 = vrot.lane.b32.xlu1 %v1256_v35, %s1709_s1 }
 0xc36   :  { %1601 = vrcp.f32 %v1252_v53 }
 0xc43   :  { %v1602_v46 = vpop.eup %1601 }
 0xca7   :  { %v1259_v56 = vpop.permute.xlu1 %1258 }
 0xca8   :  { %v1261_v27 = vadd.f32 %v1259_v56, %v1255_v29 }
 0xcaa   :  { %1603 = vtanh.f32 %v1261_v27 }
 0xcb7   :  { %v1604_v48 = vpop.eup %1603 }
 0xcb8   :  { %v1263_v49 = vmul.f32 %v1604_v48, %v1602_v46 }
 0xcba   :  { %1265 = vrot.lane.b32.xlu0 %v1263_v49, %s1709_s1 }
 0xd2c   :  { %v1266_v30 = vpop.permute.xlu0 %1265 }
 0xd2d   :  { %1269 = vst.msk [vmem:[#allocation6 + $0xc] sm:$0x3] %vm488_vm2, %v1266_v30  ;;  %1495 = vmatmul.mubr.msk.f32.vlgmr.msra.gmra.mxu1 %vm385_vm3, %v1266_v30 }
 0xded   :  { %v1364_v28 = vpop.f32.mrf.mxu1 }
 0xdee   :  { %v1369_v34 = vadd.f32 %v1364_v28, %v1294_v21 }
 0xdef   :  { %v1366_v36 = vpop.f32.mrf.mxu1 }
 0xdf0   :  { %v1496_v57 = vmul.f32 -1.442695, %v1369_v34  ;;  %v1370_v37 = vadd.f32 %v1366_v36, %v1295_v22 }
 0xdf2   :  { %1605 = vpow2.f32 %v1496_v57  ;;  %v1497_v59 = vmul.f32 -1.442695, %v1370_v37 }
 0xdf3   :  { %1607 = vtanh.f32 %v1370_v37 }
 0xdff   :  { %v1606_v58 = vpop.eup %1605 }
 0xe00   :  { %v1374_v60 = vadd.f32 1.0, %v1606_v58  ;;  %v1608_v23 = vpop.eup %1607 }
 0xe02   :  { %1609 = vrcp.f32 %v1374_v60 }
 0xe03   :  { %1611 = vpow2.f32 %v1497_v59 }
 0xe0f   :  { %v1610_v54 = vpop.eup %1609 }
 0xe10   :  { %v1385_v61 = vmul.f32 %v1610_v54, %v1608_v23  ;;  %v1612_v63 = vpop.eup %1611  ;;  %v1384_v55 = vmul.f32 %v1610_v54, %v1261_v27 }
 0xe11   :  { %v1381_v21 = vadd.f32 1.0, %v1612_v63 }
 0xe12   :  { %1387 = vrot.lane.b32.xlu1 %v1385_v61, %s1709_s1 }
 0xe13   :  { %1613 = vrcp.f32 %v1381_v21 }
 0xe20   :  { %v1614_v62 = vpop.eup %1613 }
 0xe84   :  { %v1388_v24 = vpop.permute.xlu1 %1387 }
 0xe85   :  { %v1390_v11 = vadd.f32 %v1388_v24, %v1384_v55 }
 0xe87   :  { %1615 = vtanh.f32 %v1390_v11  ;;  %1402 = vrot.lane.b32.xlu1 %v1390_v11, %s1709_s1 }
 0xe94   :  { %v1616_v14 = vpop.eup %1615 }
 0xe95   :  { %v1392_v22 = vmul.f32 %v1616_v14, %v1614_v62 }
 0xe97   :  { %1394 = vrot.lane.b32.xlu0 %v1392_v22, %s1709_s1 }
 0xef9   :  { %v1403_v25 = vpop.permute.xlu1 %1402 }
 0xefa   :  { %1405 = vst.msk [vmem:[#allocation9] sm:$0x3] %vm1399_vm4, %v1403_v25 }
 0xf09   :  { %v1395_v3 = vpop.permute.xlu0 %1394 }
 0xf0a   :  { %1398 = vst.msk [vmem:[#allocation6 + $0xe] sm:$0x3] %vm488_vm2, %v1395_v3 }
 0xf0b   :  { %1400 = vst.msk [vmem:[#allocation7] sm:$0x3] %vm1399_vm4, %v1395_v3 }
 0xf0c   :  { %1648 = shalt.err (!%p1645_p9)
}
 0xf0d   :  { %1427 = dma.vmem_to_hbm [thread:$0]  %s1425_s24, 32, %s2209_s5, [#allocation8]  }
 0xf0e   :  { %s1657_s7 = scalar_lea.vmem %s1412_s26, 256  ;;  %p1662_p11 = scmp.lt.s32.totalorder %s1412_s26, %s1412_s26 }
 0xf0f   :  { %p1658_p10 = scmp.ne.s32.totalorder %s1412_s26, %s1657_s7  ;;  %p1663_p12 = scmp.lt.s32.totalorder %s1657_s7, %s1657_s7 }
 0xf11   :  { %p1664_p13 = por %p1663_p12, %p1662_p11 }
 0xf13   :  { %p1665_p0 = pnand %p1664_p13, %p1658_p10 }
 0xf15   :  { %1668 = shalt.err (!%p1665_p0)
}
 0xf16   :  { %s1713_s8 = smov 32   ;;  %s1714_s9 = smov 2  }
 0xf17   :  { %1417 = dma.vmem_to_hbm [thread:$0]  %s1412_s26, 256, %s2208_s4, [#allocation5], %s1713_s8, %s1713_s8, %s1714_s9  }
 0xf18   :  { %s1677_s12 = scalar_lea.vmem %s1435_s3, 32  ;;  %p1682_p2 = scmp.lt.s32.totalorder %s1435_s3, %s1435_s3 }
 0xf19   :  { %p1678_p1 = scmp.ne.s32.totalorder %s1435_s3, %s1677_s12  ;;  %p1683_p3 = scmp.lt.s32.totalorder %s1677_s12, %s1677_s12 }
 0xf1b   :  { %p1684_p4 = por %p1683_p3, %p1682_p2 }
 0xf1d   :  { %p1685_p5 = pnand %p1684_p4, %p1678_p1 }
 0xf1f   :  { %1688 = shalt.err (!%p1685_p5)
}
 0xf20   :  { %1437 = dma.vmem_to_hbm [thread:$0]  %s1435_s3, 32, %s2210_s6, [#allocation8]  }
 0xf21   :  { %1699 = dma.done.wait [#allocation5], 256  }
 0xf22   :  { %1700 = vsyncadd [#allocation5], 4294967040 }
 0xf23   :  { %1701 = dma.done.wait [#allocation8], 64  }
 0xf24   :  { %1702 = vsyncadd [#allocation8], 4294967232 }
 0xf25   :  { %1447 = vsyncpa [#allocation4], 1 }
 0xf26   :  { %1448 = vsyncpa [#allocation5], 1 }
 0xf27   :  { %1449 = vsyncpa [#allocation8], 1 }

</bundles_post_ra>
